<compile_context>
chip_gen: v7x
topology: tpu7x:2x2x1
jax: 0.10.0
libtpu: 0.0.40
codegen_flags: <defaults>
</compile_context>

<pallas_src>
import functools

import numpy as np
import jax
import jax.numpy as jnp
from jax import lax
from jax.experimental import pallas as pl
from jax.experimental.pallas import tpu as pltpu


# ------------------------------ fused Pallas kernel --------------------------

def fused_encoder_kernel(lhs_ref, band_ref, sel_ch_ref, sel_ch_t_ref,
                         gamma_ref, beta_ref, bd2_ref, bias2_ref, o_ref,
                         *, inv_n):
    # ---- conv1 (9x9, pad 4): single lane-aligned fat-K bf16 matmul -----------
    h = jnp.dot(lhs_ref[...], band_ref[...],
                preferred_element_type=jnp.float32)            # (B*H, W*Ch) f32

    # ---- BatchNorm2d with batch statistics (training-mode forward) -----------
    # All rows of h are valid conv1 outputs (no junk rows), so the (b,y)-reduction
    # is a plain column sum (XLU); the x-reduction per channel is one M=2 matmul.
    colsum = jnp.sum(h, axis=0, keepdims=True)                 # (1, W*Ch)
    colsumsq = jnp.sum(h * h, axis=0, keepdims=True)           # (1, W*Ch)
    stats = jnp.dot(jnp.concatenate([colsum, colsumsq], axis=0), sel_ch_ref[...],
                    preferred_element_type=jnp.float32)        # (2, Ch)
    mean = stats[0:1, :] * inv_n
    var = stats[1:2, :] * inv_n - mean * mean                  # biased variance
    scale = gamma_ref[...] * lax.rsqrt(var + 1e-5)             # (1, Ch)
    shift = beta_ref[...] - mean * scale
    cols = jnp.dot(jnp.concatenate([scale, shift], axis=0), sel_ch_t_ref[...],
                   preferred_element_type=jnp.float32)         # (2, W*Ch)
    h = h * cols[0:1, :] + cols[1:2, :]
    h = jnp.where(h >= 0, h, 0.01 * h)                         # leaky_relu(0.01)

    # ---- conv2 (5x5, stride 5) + sigmoid --------------------------------------
    # Rows are already grouped by ky2 (wrapper permutation), so each group is an
    # 8-row-aligned static slice; 5 independent matmuls, pairwise-tree summed.
    kh2 = bd2_ref.shape[0]
    m2 = o_ref.shape[0]
    parts = [jnp.dot(h[ky * m2:(ky + 1) * m2, :].astype(jnp.bfloat16), bd2_ref[ky],
                     preferred_element_type=jnp.float32)
             for ky in range(kh2)]
    while len(parts) > 1:
        parts = [parts[i] + parts[i + 1] if i + 1 < len(parts) else parts[i]
                 for i in range(0, len(parts), 2)]
    o_ref[...] = jax.nn.sigmoid(parts[0] + bias2_ref[...])


# ------------------------------ wrapper / glue --------------------------------

def _full_spec(shape):
    nd = len(shape)
    return pl.BlockSpec(shape, lambda i, _nd=nd: (0,) * _nd)


def _build_conv1_band(w1, w_out, wp):
    # w1: (Ch, C, 9, 9) OIHW.  band[ky, (x+kx)*C + c, x*Ch + ch] = w1[ch, c, ky, kx]
    ch, c, kh, kw = w1.shape
    w1_t = jnp.transpose(w1, (2, 3, 1, 0))                          # (kh, kw, C, Ch)
    ky, kx, ci, chi, xo = np.meshgrid(np.arange(kh), np.arange(kw), np.arange(c),
                                      np.arange(ch), np.arange(w_out), indexing="ij")
    rows = (xo + kx) * c + ci
    cols = xo * ch + chi
    band = jnp.zeros((kh, wp * c, w_out * ch), jnp.float32)
    return band.at[ky, rows, cols].set(w1_t[ky, kx, ci, chi])


def _build_conv2_blockdiag(w2, w_in, wo):
    # w2: (K, Ch, 5, 5) OIHW, stride == kernel width.
    # bd[ky, x*Ch + ch, (x//5)*K + k] = w2[k, ch, ky, x % 5]
    k, ch, kh, kw = w2.shape
    w2_t = jnp.transpose(w2, (2, 3, 1, 0))                          # (kh, kw, Ch, K)
    ky, xi, chi, ki = np.meshgrid(np.arange(kh), np.arange(w_in), np.arange(ch),
                                  np.arange(k), indexing="ij")
    rows = xi * ch + chi
    cols = (xi // kw) * k + ki
    bd = jnp.zeros((kh, w_in * ch, wo * k), jnp.float32)
    return bd.at[ky, rows, cols].set(w2_t[ky, xi % kw, chi, ki])


def encoder_cnn_medium_forward(x, params):
    B, C, H, W = x.shape
    Ch = params["w1"].shape[0]
    K = params["w2"].shape[0]
    KH1, PAD1 = 9, 4
    KH2, STR2 = 5, 5
    assert H % STR2 == 0 and W % STR2 == 0
    Hp, Wp = H + 2 * PAD1, W + 2 * PAD1
    Ho, Wo = H // STR2, W // STR2
    KPAD = 128 * pl.cdiv(Wp * C, 128)            # lane-aligned conv1 contraction chunk
    M2 = B * Ho                                  # conv2 output rows per ky2 group

    # ---- lane-aligned, row-permuted im2col LHS for conv1 (layout-only, tiny) ----
    xp = jnp.pad(jnp.transpose(x, (0, 2, 3, 1)),
                 ((0, 0), (PAD1, PAD1), (PAD1, PAD1), (0, 0)))      # (B, Hp, Wp, C)
    xp2 = jnp.pad(xp.reshape(B, Hp, Wp * C), ((0, 0), (0, 0), (0, KPAD - Wp * C)))
    lhs = jnp.concatenate([xp2[:, ky:ky + H, :] for ky in range(KH1)], axis=-1)
    # Reorder rows to (ky2, b, ho) with y = 5*ho + ky2, so conv2's stride-5 row
    # groups are contiguous M2-row slices of the conv1 output.
    lhs = lhs.reshape(B, Ho, STR2, KH1 * KPAD).transpose(2, 0, 1, 3)
    lhs = lhs.reshape(STR2 * M2, KH1 * KPAD).astype(jnp.bfloat16)
    # Guard the permutation / BN-stat consistency against future shape changes.
    assert STR2 * M2 == B * H and lhs.shape == (B * H, KH1 * KPAD)

    # ---- weights as banded / block-diagonal matrices (batch-independent) --------
    band1 = _build_conv1_band(params["w1"], W, Wp)                  # (9, Wp*C, W*Ch)
    band1 = jnp.pad(band1, ((0, 0), (0, KPAD - Wp * C), (0, 0)))
    band1 = band1.reshape(KH1 * KPAD, W * Ch).astype(jnp.bfloat16)  # stacked fat-K RHS
    bd2 = _build_conv2_blockdiag(params["w2"], W, Wo).astype(jnp.bfloat16)
    bias2 = jnp.tile(params["b2"], Wo).reshape(1, Wo * K)
    gamma = params["bn_gamma"].reshape(1, Ch)
    beta = params["bn_beta"].reshape(1, Ch)
    # NOTE: conv1 bias b1 is intentionally NOT passed to the kernel -- it cancels
    # exactly under training-mode BatchNorm (shifts the mean, variance unchanged).

    sel_ch = np.zeros((W * Ch, Ch), np.float32)                     # (x,ch)-col -> ch
    sel_ch[np.arange(W * Ch), np.arange(W * Ch) % Ch] = 1.0
    sel_ch_t = np.ascontiguousarray(sel_ch.T)                       # ch -> (x,ch)-col

    inputs = [lhs, band1, jnp.asarray(sel_ch), jnp.asarray(sel_ch_t),
              gamma, beta, bd2, bias2]

    flops = (2 * (B * H) * (KH1 * KPAD) * (W * Ch)        # conv1 fat-K matmul
             + 2 * 2 * (W * Ch) * Ch * 2                  # two M=2 BN matmuls
             + 2 * KH2 * M2 * (W * Ch) * (Wo * K)         # conv2
             + 6 * (B * H) * (W * Ch))                    # BN apply + leaky + sumsq
    bytes_accessed = (sum(int(np.prod(a.shape)) * a.dtype.itemsize for a in inputs)
                      + M2 * Wo * K * 4)

    out2d = pl.pallas_call(
        functools.partial(fused_encoder_kernel, inv_n=1.0 / float(B * H * W)),
        grid=(1,),
        out_shape=jax.ShapeDtypeStruct((M2, Wo * K), jnp.float32),
        in_specs=[_full_spec(tuple(a.shape)) for a in inputs],
        out_specs=_full_spec((M2, Wo * K)),
        compiler_params=pltpu.CompilerParams(
            dimension_semantics=("arbitrary",),
            vmem_limit_bytes=8 * 1024 * 1024),
        cost_estimate=pl.CostEstimate(flops=int(flops),
                                      transcendentals=M2 * Wo * K + Ch,
                                      bytes_accessed=int(bytes_accessed)),
    )(*inputs)

    # (b*Ho+ho, wo*K+k) -> (B, K, Ho, Wo); a 128-element transpose, negligible glue.
    return out2d.reshape(B, Ho, Wo, K).transpose(0, 3, 1, 2)


# ------------------------------ params & reference ----------------------------

def init_params(key, input_dim, hidden_dim, num_objects):
    ks = jax.random.split(key, 4)

    def u(k, shape, scale=0.1):
        return jax.random.uniform(k, shape, jnp.float32, -1.0, 1.0) * scale

    return dict(
        w1=u(ks[0], (hidden_dim, input_dim, 9, 9)),
        b1=u(ks[1], (hidden_dim,)),
        bn_gamma=jnp.ones((hidden_dim,), jnp.float32),   # BatchNorm2d default init
        bn_beta=jnp.zeros((hidden_dim,), jnp.float32),
        w2=u(ks[2], (num_objects, hidden_dim, 5, 5)),
        b2=u(ks[3], (num_objects,)),
    )


def reference_forward(x, params):
    # Pure-JAX reference mirroring the PyTorch forward (training-mode BatchNorm).
    eps = 1e-5
    y = lax.conv_general_dilated(x, params["w1"], (1, 1), ((4, 4), (4, 4)),
                                 dimension_numbers=("NCHW", "OIHW", "NCHW"))
    y = y + params["b1"][None, :, None, None]
    mean = jnp.mean(y, axis=(0, 2, 3), keepdims=True)
    var = jnp.mean(jnp.square(y - mean), axis=(0, 2, 3), keepdims=True)
    y = (y - mean) / jnp.sqrt(var + eps)
    y = y * params["bn_gamma"][None, :, None, None] + params["bn_beta"][None, :, None, None]
    y = jnp.where(y >= 0, y, 0.01 * y)
    y = lax.conv_general_dilated(y, params["w2"], (5, 5), "VALID",
                                 dimension_numbers=("NCHW", "OIHW", "NCHW"))
    return jax.nn.sigmoid(y + params["b2"][None, :, None, None])


# ------------------------------ main ------------------------------------------

if __name__ == "__main__":
    # Small shapes consistent with EncoderCNNMedium: NCHW input, H, W divisible by 5.
    B, C, H, W = 2, 3, 20, 20
    hidden_dim, num_objects = 16, 4

    key = jax.random.PRNGKey(0)
    kx, kp = jax.random.split(key)
    x = jax.random.normal(kx, (B, C, H, W), jnp.float32)
    params = init_params(kp, C, hidden_dim, num_objects)

    out = jax.jit(encoder_cnn_medium_forward)(x, params)
    out = jax.block_until_ready(out)

    ref = reference_forward(x, params)
    assert out.shape == (B, num_objects, H // 5, W // 5), out.shape
    assert bool(jnp.all(jnp.isfinite(out)))
    max_err = float(jnp.max(jnp.abs(out - ref)))
    # bf16 MXU operands (f32 accumulate) vs XLA f32 conv reference.
    assert max_err < 5e-2, f"max abs err {max_err}"
    print("KERNEL_OK")
</pallas_src>

<mosaic_0001>
module attributes {stable_mosaic.version = 11 : i64} {
  func.func @fused_encoder_kernel(%arg0: i32, %arg1: memref<40x1152xbf16, #tpu.memory_space<vmem>>, %arg2: memref<1152x320xbf16, #tpu.memory_space<vmem>>, %arg3: memref<320x16xf32, #tpu.memory_space<vmem>>, %arg4: memref<16x320xf32, #tpu.memory_space<vmem>>, %arg5: memref<1x16xf32, #tpu.memory_space<vmem>>, %arg6: memref<1x16xf32, #tpu.memory_space<vmem>>, %arg7: memref<5x320x16xbf16, #tpu.memory_space<vmem>>, %arg8: memref<1x16xf32, #tpu.memory_space<vmem>>, %arg9: memref<8x16xf32, #tpu.memory_space<vmem>>) attributes {dimension_semantics = [#tpu.dimension_semantics<arbitrary>], iteration_bounds = array<i64: 1>, scalar_prefetch = 0 : i64, scratch_operands = 0 : i64, tpu.core_type = #tpu.core_type<tc>, window_params = [{pipeline_mode = #tpu.pipeline_mode<synchronous>, transform_indices = @transform_0, window_bounds = array<i64: 40, 1152>}, {pipeline_mode = #tpu.pipeline_mode<synchronous>, transform_indices = @transform_1, window_bounds = array<i64: 1152, 320>}, {pipeline_mode = #tpu.pipeline_mode<synchronous>, transform_indices = @transform_2, window_bounds = array<i64: 320, 16>}, {pipeline_mode = #tpu.pipeline_mode<synchronous>, transform_indices = @transform_3, window_bounds = array<i64: 16, 320>}, {pipeline_mode = #tpu.pipeline_mode<synchronous>, transform_indices = @transform_4, window_bounds = array<i64: 1, 16>}, {pipeline_mode = #tpu.pipeline_mode<synchronous>, transform_indices = @transform_5, window_bounds = array<i64: 1, 16>}, {pipeline_mode = #tpu.pipeline_mode<synchronous>, transform_indices = @transform_6, window_bounds = array<i64: 5, 320, 16>}, {pipeline_mode = #tpu.pipeline_mode<synchronous>, transform_indices = @transform_7, window_bounds = array<i64: 1, 16>}, {pipeline_mode = #tpu.pipeline_mode<synchronous>, transform_indices = @transform_8, window_bounds = array<i64: 8, 16>}]} {
    %c0 = arith.constant 0 : index
    %c0_0 = arith.constant 0 : index
    %0 = vector.load %arg1[%c0, %c0_0] : memref<40x1152xbf16, #tpu.memory_space<vmem>>, vector<40x1152xbf16>
    %c0_1 = arith.constant 0 : index
    %c0_2 = arith.constant 0 : index
    %1 = vector.load %arg2[%c0_1, %c0_2] : memref<1152x320xbf16, #tpu.memory_space<vmem>>, vector<1152x320xbf16>
    %cst = arith.constant dense<0.000000e+00> : vector<40x320xf32>
    %2 = tpu.matmul %0, %1, %cst {dimension_numbers = #tpu.dot_dimension_numbers<[1], [0], [0], [1], [0, 0, 1, 1], [], []>} : vector<40x1152xbf16>, vector<1152x320xbf16>, vector<40x320xf32> -> vector<40x320xf32>
    %cst_3 = arith.constant dense<0.000000e+00> : vector<320xf32>
    %3 = vector.multi_reduction <add>, %2, %cst_3 [0] : vector<40x320xf32> to vector<320xf32>
    %4 = vector.shape_cast %3 : vector<320xf32> to vector<1x320xf32>
    %5 = arith.mulf %2, %2 : vector<40x320xf32>
    %cst_4 = arith.constant dense<0.000000e+00> : vector<320xf32>
    %6 = vector.multi_reduction <add>, %5, %cst_4 [0] : vector<40x320xf32> to vector<320xf32>
    %7 = vector.shape_cast %6 : vector<320xf32> to vector<1x320xf32>
    %8 = tpu.concatenate %4, %7 in 0 : vector<1x320xf32>, vector<1x320xf32> -> vector<2x320xf32>
    %c0_5 = arith.constant 0 : index
    %c0_6 = arith.constant 0 : index
    %9 = vector.load %arg3[%c0_5, %c0_6] : memref<320x16xf32, #tpu.memory_space<vmem>>, vector<320x16xf32>
    %cst_7 = arith.constant dense<0.000000e+00> : vector<2x16xf32>
    %10 = tpu.matmul %8, %9, %cst_7 {dimension_numbers = #tpu.dot_dimension_numbers<[1], [0], [0], [1], [0, 0, 1, 1], [], []>} : vector<2x320xf32>, vector<320x16xf32>, vector<2x16xf32> -> vector<2x16xf32>
    %11 = vector.extract_strided_slice %10 {offsets = [0, 0], sizes = [1, 16], strides = [1, 1]} : vector<2x16xf32> to vector<1x16xf32>
    %cst_8 = arith.constant 1.250000e-03 : f32
    %12 = vector.broadcast %cst_8 : f32 to vector<1x16xf32>
    %13 = arith.mulf %11, %12 : vector<1x16xf32>
    %14 = vector.extract_strided_slice %10 {offsets = [1, 0], sizes = [1, 16], strides = [1, 1]} : vector<2x16xf32> to vector<1x16xf32>
    %cst_9 = arith.constant 1.250000e-03 : f32
    %15 = vector.broadcast %cst_9 : f32 to vector<1x16xf32>
    %16 = arith.mulf %14, %15 : vector<1x16xf32>
    %17 = arith.mulf %13, %13 : vector<1x16xf32>
    %18 = arith.subf %16, %17 : vector<1x16xf32>
    %c0_10 = arith.constant 0 : index
    %c0_11 = arith.constant 0 : index
    %19 = vector.load %arg5[%c0_10, %c0_11] : memref<1x16xf32, #tpu.memory_space<vmem>>, vector<1x16xf32>
    %cst_12 = arith.constant 9.99999974E-6 : f32
    %20 = vector.broadcast %cst_12 : f32 to vector<1x16xf32>
    %21 = arith.addf %18, %20 : vector<1x16xf32>
    %22 = math.rsqrt %21 : vector<1x16xf32>
    %23 = arith.mulf %19, %22 : vector<1x16xf32>
    %c0_13 = arith.constant 0 : index
    %c0_14 = arith.constant 0 : index
    %24 = vector.load %arg6[%c0_13, %c0_14] : memref<1x16xf32, #tpu.memory_space<vmem>>, vector<1x16xf32>
    %25 = arith.mulf %13, %23 : vector<1x16xf32>
    %26 = arith.subf %24, %25 : vector<1x16xf32>
    %27 = tpu.concatenate %23, %26 in 0 : vector<1x16xf32>, vector<1x16xf32> -> vector<2x16xf32>
    %c0_15 = arith.constant 0 : index
    %c0_16 = arith.constant 0 : index
    %28 = vector.load %arg4[%c0_15, %c0_16] : memref<16x320xf32, #tpu.memory_space<vmem>>, vector<16x320xf32>
    %cst_17 = arith.constant dense<0.000000e+00> : vector<2x320xf32>
    %29 = tpu.matmul %27, %28, %cst_17 {dimension_numbers = #tpu.dot_dimension_numbers<[1], [0], [0], [1], [0, 0, 1, 1], [], []>} : vector<2x16xf32>, vector<16x320xf32>, vector<2x320xf32> -> vector<2x320xf32>
    %30 = vector.extract_strided_slice %29 {offsets = [0, 0], sizes = [1, 320], strides = [1, 1]} : vector<2x320xf32> to vector<1x320xf32>
    %31 = vector.broadcast %30 : vector<1x320xf32> to vector<40x320xf32>
    %32 = arith.mulf %2, %31 : vector<40x320xf32>
    %33 = vector.extract_strided_slice %29 {offsets = [1, 0], sizes = [1, 320], strides = [1, 1]} : vector<2x320xf32> to vector<1x320xf32>
    %34 = vector.broadcast %33 : vector<1x320xf32> to vector<40x320xf32>
    %35 = arith.addf %32, %34 : vector<40x320xf32>
    %cst_18 = arith.constant 0.000000e+00 : f32
    %36 = vector.broadcast %cst_18 : f32 to vector<40x320xf32>
    %37 = arith.cmpf oge, %35, %36 : vector<40x320xf32>
    %cst_19 = arith.constant 0.00999999977 : f32
    %38 = vector.broadcast %cst_19 : f32 to vector<40x320xf32>
    %39 = arith.mulf %38, %35 : vector<40x320xf32>
    %40 = arith.select %37, %35, %39 : vector<40x320xi1>, vector<40x320xf32>
    %41 = vector.extract_strided_slice %40 {offsets = [0, 0], sizes = [8, 320], strides = [1, 1]} : vector<40x320xf32> to vector<8x320xf32>
    %42 = arith.truncf %41 : vector<8x320xf32> to vector<8x320xbf16>
    %c0_20 = arith.constant 0 : index
    %c0_21 = arith.constant 0 : index
    %c0_22 = arith.constant 0 : index
    %43 = vector.load %arg7[%c0_20, %c0_21, %c0_22] : memref<5x320x16xbf16, #tpu.memory_space<vmem>>, vector<1x320x16xbf16>
    %44 = vector.shape_cast %43 : vector<1x320x16xbf16> to vector<320x16xbf16>
    %cst_23 = arith.constant dense<0.000000e+00> : vector<8x16xf32>
    %45 = tpu.matmul %42, %44, %cst_23 {dimension_numbers = #tpu.dot_dimension_numbers<[1], [0], [0], [1], [0, 0, 1, 1], [], []>} : vector<8x320xbf16>, vector<320x16xbf16>, vector<8x16xf32> -> vector<8x16xf32>
    %46 = vector.extract_strided_slice %40 {offsets = [8, 0], sizes = [8, 320], strides = [1, 1]} : vector<40x320xf32> to vector<8x320xf32>
    %47 = arith.truncf %46 : vector<8x320xf32> to vector<8x320xbf16>
    %c1 = arith.constant 1 : index
    %c0_24 = arith.constant 0 : index
    %c0_25 = arith.constant 0 : index
    %48 = vector.load %arg7[%c1, %c0_24, %c0_25] : memref<5x320x16xbf16, #tpu.memory_space<vmem>>, vector<1x320x16xbf16>
    %49 = vector.shape_cast %48 : vector<1x320x16xbf16> to vector<320x16xbf16>
    %cst_26 = arith.constant dense<0.000000e+00> : vector<8x16xf32>
    %50 = tpu.matmul %47, %49, %cst_26 {dimension_numbers = #tpu.dot_dimension_numbers<[1], [0], [0], [1], [0, 0, 1, 1], [], []>} : vector<8x320xbf16>, vector<320x16xbf16>, vector<8x16xf32> -> vector<8x16xf32>
    %51 = vector.extract_strided_slice %40 {offsets = [16, 0], sizes = [8, 320], strides = [1, 1]} : vector<40x320xf32> to vector<8x320xf32>
    %52 = arith.truncf %51 : vector<8x320xf32> to vector<8x320xbf16>
    %c2 = arith.constant 2 : index
    %c0_27 = arith.constant 0 : index
    %c0_28 = arith.constant 0 : index
    %53 = vector.load %arg7[%c2, %c0_27, %c0_28] : memref<5x320x16xbf16, #tpu.memory_space<vmem>>, vector<1x320x16xbf16>
    %54 = vector.shape_cast %53 : vector<1x320x16xbf16> to vector<320x16xbf16>
    %cst_29 = arith.constant dense<0.000000e+00> : vector<8x16xf32>
    %55 = tpu.matmul %52, %54, %cst_29 {dimension_numbers = #tpu.dot_dimension_numbers<[1], [0], [0], [1], [0, 0, 1, 1], [], []>} : vector<8x320xbf16>, vector<320x16xbf16>, vector<8x16xf32> -> vector<8x16xf32>
    %56 = vector.extract_strided_slice %40 {offsets = [24, 0], sizes = [8, 320], strides = [1, 1]} : vector<40x320xf32> to vector<8x320xf32>
    %57 = arith.truncf %56 : vector<8x320xf32> to vector<8x320xbf16>
    %c3 = arith.constant 3 : index
    %c0_30 = arith.constant 0 : index
    %c0_31 = arith.constant 0 : index
    %58 = vector.load %arg7[%c3, %c0_30, %c0_31] : memref<5x320x16xbf16, #tpu.memory_space<vmem>>, vector<1x320x16xbf16>
    %59 = vector.shape_cast %58 : vector<1x320x16xbf16> to vector<320x16xbf16>
    %cst_32 = arith.constant dense<0.000000e+00> : vector<8x16xf32>
    %60 = tpu.matmul %57, %59, %cst_32 {dimension_numbers = #tpu.dot_dimension_numbers<[1], [0], [0], [1], [0, 0, 1, 1], [], []>} : vector<8x320xbf16>, vector<320x16xbf16>, vector<8x16xf32> -> vector<8x16xf32>
    %61 = vector.extract_strided_slice %40 {offsets = [32, 0], sizes = [8, 320], strides = [1, 1]} : vector<40x320xf32> to vector<8x320xf32>
    %62 = arith.truncf %61 : vector<8x320xf32> to vector<8x320xbf16>
    %c4 = arith.constant 4 : index
    %c0_33 = arith.constant 0 : index
    %c0_34 = arith.constant 0 : index
    %63 = vector.load %arg7[%c4, %c0_33, %c0_34] : memref<5x320x16xbf16, #tpu.memory_space<vmem>>, vector<1x320x16xbf16>
    %64 = vector.shape_cast %63 : vector<1x320x16xbf16> to vector<320x16xbf16>
    %cst_35 = arith.constant dense<0.000000e+00> : vector<8x16xf32>
    %65 = tpu.matmul %62, %64, %cst_35 {dimension_numbers = #tpu.dot_dimension_numbers<[1], [0], [0], [1], [0, 0, 1, 1], [], []>} : vector<8x320xbf16>, vector<320x16xbf16>, vector<8x16xf32> -> vector<8x16xf32>
    %66 = arith.addf %45, %50 : vector<8x16xf32>
    %67 = arith.addf %55, %60 : vector<8x16xf32>
    %68 = arith.addf %66, %67 : vector<8x16xf32>
    %69 = arith.addf %68, %65 : vector<8x16xf32>
    %c0_36 = arith.constant 0 : index
    %c0_37 = arith.constant 0 : index
    %70 = vector.load %arg8[%c0_36, %c0_37] : memref<1x16xf32, #tpu.memory_space<vmem>>, vector<1x16xf32>
    %71 = vector.broadcast %70 : vector<1x16xf32> to vector<8x16xf32>
    %72 = arith.addf %69, %71 : vector<8x16xf32>
    %73 = arith.negf %72 : vector<8x16xf32>
    %74 = math.exp %73 : vector<8x16xf32>
    %cst_38 = arith.constant 1.000000e+00 : f32
    %75 = vector.broadcast %cst_38 : f32 to vector<8x16xf32>
    %76 = arith.addf %75, %74 : vector<8x16xf32>
    %77 = arith.divf %75, %76 : vector<8x16xf32>
    %c0_39 = arith.constant 0 : index
    %c0_40 = arith.constant 0 : index
    %78 = vector.load %arg9[%c0_39, %c0_40] : memref<8x16xf32, #tpu.memory_space<vmem>>, vector<8x16xf32>
    tpu.vector_store %arg9[%c0_39, %c0_40], %77 {strides = array<i32>} : memref<8x16xf32, #tpu.memory_space<vmem>>, vector<8x16xf32>,
    return
  }
  func.func @transform_0(%arg0: i32) -> (i32, i32) {
    %c0_i32 = arith.constant 0 : i32
    %c0_i32_0 = arith.constant 0 : i32
    %c0_i32_1 = arith.constant 0 : i32
    return %c0_i32, %c0_i32_0 : i32, i32
  }
  func.func @transform_1(%arg0: i32) -> (i32, i32) {
    %c0_i32 = arith.constant 0 : i32
    %c0_i32_0 = arith.constant 0 : i32
    %c0_i32_1 = arith.constant 0 : i32
    return %c0_i32, %c0_i32_0 : i32, i32
  }
  func.func @transform_2(%arg0: i32) -> (i32, i32) {
    %c0_i32 = arith.constant 0 : i32
    %c0_i32_0 = arith.constant 0 : i32
    %c0_i32_1 = arith.constant 0 : i32
    return %c0_i32, %c0_i32_0 : i32, i32
  }
  func.func @transform_3(%arg0: i32) -> (i32, i32) {
    %c0_i32 = arith.constant 0 : i32
    %c0_i32_0 = arith.constant 0 : i32
    %c0_i32_1 = arith.constant 0 : i32
    return %c0_i32, %c0_i32_0 : i32, i32
  }
  func.func @transform_4(%arg0: i32) -> (i32, i32) {
    %c0_i32 = arith.constant 0 : i32
    %c0_i32_0 = arith.constant 0 : i32
    %c0_i32_1 = arith.constant 0 : i32
    return %c0_i32, %c0_i32_0 : i32, i32
  }
  func.func @transform_5(%arg0: i32) -> (i32, i32) {
    %c0_i32 = arith.constant 0 : i32
    %c0_i32_0 = arith.constant 0 : i32
    %c0_i32_1 = arith.constant 0 : i32
    return %c0_i32, %c0_i32_0 : i32, i32
  }
  func.func @transform_6(%arg0: i32) -> (i32, i32, i32) {
    %c0_i32 = arith.constant 0 : i32
    %c0_i32_0 = arith.constant 0 : i32
    %c0_i32_1 = arith.constant 0 : i32
    %c0_i32_2 = arith.constant 0 : i32
    return %c0_i32, %c0_i32_0, %c0_i32_1 : i32, i32, i32
  }
  func.func @transform_7(%arg0: i32) -> (i32, i32) {
    %c0_i32 = arith.constant 0 : i32
    %c0_i32_0 = arith.constant 0 : i32
    %c0_i32_1 = arith.constant 0 : i32
    return %c0_i32, %c0_i32_0 : i32, i32
  }
  func.func @transform_8(%arg0: i32) -> (i32, i32) {
    %c0_i32 = arith.constant 0 : i32
    %c0_i32_0 = arith.constant 0 : i32
    %c0_i32_1 = arith.constant 0 : i32
    return %c0_i32, %c0_i32_0 : i32, i32
  }
}

</mosaic_0001>

<bundles_post_ra>
// kernel: tile.8
= control target key start
LH: loop header
LB: loop body
LE: loop exit
PB: predicated region body
PF: predicated region fallthrough
CT: control target
= control target key end

     0   :  { %s22_s0 = inlined_call_operand.vmem [shape: f32[4], index: 0, kind: input, shape index: {}]   ;;  %s23_s1 = inlined_call_operand.vmem [shape: f32[4,4], index: 1, kind: output, shape index: {}]  }
   0x1   :  { %v4_v0 = vld [vmem:[%s22_s0] ss:$0 sm:$0xff] }
   0x2   :  { %5 = vst [vmem:[%s23_s1] sm:$0xf] %v4_v0 }

// kernel: tile.9
= control target key start
LH: loop header
LB: loop body
LE: loop exit
PB: predicated region body
PF: predicated region fallthrough
CT: control target
= control target key end

     0   :  { %vm7_vm0 = vcmask 31744   ;;  %s37_s8 = smov 4   ;;  %s38_s9 = smov 8   ;;  %vm13_vm1 = vcmask 130144   ;;  %vm19_vm2 = vcmask 97344   ;;  %vm25_vm3 = vcmask 64544   ;;  %s55_s0 = inlined_call_operand.vmem [shape: f32[4,4], index: 0, kind: input, shape index: {}]   ;;  %s56_s1 = inlined_call_operand.vmem [shape: f32[1,16], index: 1, kind: output, shape index: {}]  }
   0x1   :  { %v4_v0 = vld [vmem:[%s55_s0] sm:$0xf]  ;;  %s36_s0 = smov 12  }
   0x2   :  { %5 = vst [vmem:[#allocation1] sm:$0xf] %v4_v0 }
   0x9   :  { %v10_v1 = vld [vmem:[#allocation1 + $0x3] sm:$0x1]   ;;  %v22_v2 = vld [vmem:[#allocation1 + $0x1] sm:$0x1]   ;;  %v6_v3 = vld [vmem:[#allocation1] sm:$0x1]  }
   0xa   :  { %11 = vrot.lane.b32.xlu0 %v10_v1, %s36_s0  ;;  %23 = vrot.lane.b32.xlu1 %v22_v2, %s37_s8  ;;  %v16_v4 = vld [vmem:[#allocation1 + $0x2] sm:$0x1]   ;;  %8 = vst.msk [vmem:[#allocation0] sm:$0x1] %vm7_vm0, %v6_v3  }
   0xe   :  { %17 = vrot.lane.b32.xlu0 %v16_v4, %s38_s9 }
  0x7c   :  { %v12_v5 = vpop.permute.xlu0 %11   ;;  %v24_v6 = vpop.permute.xlu1 %23  }
  0x7d   :  { %14 = vst.msk [vmem:[#allocation0] sm:$0x1] %vm13_vm1, %v12_v5  }
  0x80   :  { %v18_v7 = vpop.permute.xlu0 %17  }
  0x81   :  { %20 = vst.msk [vmem:[#allocation0] sm:$0x1] %vm19_vm2, %v18_v7  }
  0x82   :  { %26 = vst.msk [vmem:[#allocation0] sm:$0x1] %vm25_vm3, %v24_v6  }
  0x89   :  { %v30_v8 = vld [vmem:[#allocation0] sm:$0x1] }
  0x8a   :  { %32 = vst [vmem:[%s56_s1] sm:$0x1] %v30_v8 }

// kernel: encoder_cnn_medium_forward.1
= control target key start
LH: loop header
LB: loop body
LE: loop exit
PB: predicated region body
PF: predicated region fallthrough
CT: control target
= control target key end

     0   :  { %13 = vsyncpa [#allocation3], 0  ;;  %s5550_s27 = smov [#allocation2]   ;;  %s6483_s0 = inlined_call_operand.vmem [shape: bf16[40,1152], index: 0, kind: input, shape index: {}]   ;;  %s6484_s1 = inlined_call_operand.hbm [shape: bf16[1152,320], index: 1, kind: input, shape index: {}]   ;;  %s6485_s2 = inlined_call_operand.vmem [shape: f32[320,16], index: 2, kind: input, shape index: {}]   ;;  %s6486_s3 = inlined_call_operand.vmem [shape: f32[16,320], index: 3, kind: input, shape index: {}]   ;;  %s6487_s4 = inlined_call_operand.vmem [shape: f32[1,16], index: 4, kind: input, shape index: {}]   ;;  %s6488_s5 = inlined_call_operand.vmem [shape: f32[1,16], index: 5, kind: input, shape index: {}]   ;;  %s6489_s6 = inlined_call_operand.vmem [shape: bf16[5,320,16], index: 6, kind: input, shape index: {}]   ;;  %s6490_s7 = inlined_call_operand.vmem [shape: f32[1,16], index: 7, kind: input, shape index: {}]   ;;  %s6491_s8 = inlined_call_operand.vmem [shape: f32[8,16], index: 8, kind: output, shape index: {}]  }
   0x1   :  { %s21_s28 = sshll.u32 %s5550_s27, 4  ;;  %s5526_s9 = scalar_lea.hbm %s6484_s1, 27648  ;;  %s22_s28 = int_to_ptr.vmem [resolvable:$true] %s21_s28 }
   0x2   :  { %p5527_p0 = scmp.ne.s32.totalorder %s6484_s1, %s5526_s9  ;;  %p5530_p1 = scmp.lt.u32.totalorder %s5526_s9, %s6484_s1 }
   0x4   :  { %p5532_p2 = pnand %p5530_p1, %p5527_p0 }
   0x6   :  { %5535 = shalt.err (!%p5532_p2)
}
   0x7   :  { %s5536_s14 = scalar_lea.vmem %s22_s28, 27648  ;;  %p5541_p4 = scmp.lt.s32.totalorder %s22_s28, %s22_s28 }
   0x8   :  { %p5537_p3 = scmp.ne.s32.totalorder %s22_s28, %s5536_s14  ;;  %p5542_p5 = scmp.lt.s32.totalorder %s5536_s14, %s5536_s14 }
   0xa   :  { %p5543_p6 = por %p5542_p5, %p5541_p4 }
   0xc   :  { %p5544_p7 = pnand %p5543_p6, %p5537_p3 }
   0xe   :  { %5547 = shalt.err (!%p5544_p7)
}
   0xf   :  { %s5551_s15 = smov 192   ;;  %s5552_s16 = smov 12  }
  0x10   :  { %27 = dma.hbm_to_vmem [thread:$0]  %s6484_s1, 27648, %s22_s28, [#allocation3], %s5551_s15, %s5551_s15, %s5552_s16  }
  0x11   :  { %5548 = dma.done.wait [#allocation3], 27648  }
  0x12   :  { %5549 = vsyncadd [#allocation3], 4294939648  ;;  %v5097_v0 = vld [vmem:[#allocation2 + $0x4] ss:$12 sps:$4 sm:$0xff]   ;;  %v5099_v1 = vld [vmem:[#allocation2] ss:$12 sps:$4 sm:$0xff]  }
  0x13   :  { %1633 = vmatprep.subr.bf16.mxu0 %v5097_v0  ;;  %v5100_v2 = vld [vmem:[#allocation2 + $0x1c] ss:$12 sps:$4 sm:$0xff]   ;;  %v5102_v3 = vld [vmem:[#allocation2 + $0x18] ss:$12 sps:$4 sm:$0xff]   ;;  %v5105_v6 = vld [vmem:[#allocation2 + $0x34] ss:$12 sps:$4 sm:$0xff]  }
  0x14   :  { %1634 = vmatpush1.bf16.msra.mxu0 %v5099_v1  ;;  %v5103_v4 = vld [vmem:[#allocation2 + $0xc8] ss:$12 sps:$4 sm:$0xff]   ;;  %v5107_v7 = vld [vmem:[#allocation2 + $0x30] ss:$12 sps:$4 sm:$0xff]   ;;  %v5108_v8 = vld [vmem:[#allocation2 + $0xe0] ss:$12 sps:$4 sm:$0xff]  }
  0x15   :  { %1635 = vmatprep.subr.bf16.mxu0 %v5100_v2  ;;  %v5104_v5 = vld [vmem:[#allocation2 + $0x8] ss:$12 sps:$4 sm:$0xff]   ;;  %4547 = vmatprep.subr.bf16.mxu1 %v5103_v4  ;;  %v5109_v9 = vld [vmem:[#allocation2 + $0x20] ss:$12 sps:$4 sm:$0xff]   ;;  %v5113_v12 = vld [vmem:[#allocation2 + $0xf8] ss:$12 sps:$4 sm:$0xff]  }
  0x16   :  { %4548 = vmatpush3.bf16.msra.mxu1 %v5104_v5  ;;  %v5110_v10 = vld [vmem:[#allocation2 + $0x4c] ss:$12 sps:$4 sm:$0xff]   ;;  %v5112_v11 = vld [vmem:[#allocation2 + $0x48] ss:$12 sps:$4 sm:$0xff]   ;;  %v5115_v14 = vld [vmem:[#allocation2 + $0x64] ss:$12 sps:$4 sm:$0xff]  }
  0x17   :  { %4549 = vmatprep.subr.bf16.mxu1 %v5108_v8  ;;  %v5114_v13 = vld [vmem:[#allocation2 + $0x38] ss:$12 sps:$4 sm:$0xff]   ;;  %v5118_v15 = vld [vmem:[#allocation2 + $0x110] ss:$12 sps:$4 sm:$0xff]   ;;  %v5117_v17 = vld [vmem:[#allocation2 + $0x60] ss:$12 sps:$4 sm:$0xff]  }
  0x18   :  { %1636 = vmatpush1.bf16.msra.mxu0 %v5102_v3  ;;  %v5119_v16 = vld [vmem:[#allocation2 + $0x50] ss:$12 sps:$4 sm:$0xff]   ;;  %v5123_v19 = vld [vmem:[#allocation2 + $0x128] ss:$12 sps:$4 sm:$0xff]   ;;  %v5122_v20 = vld [vmem:[#allocation2 + $0x78] ss:$12 sps:$4 sm:$0xff]  }
  0x19   :  { %1637 = vmatprep.subr.bf16.mxu0 %v5105_v6  ;;  %v5120_v18 = vld [vmem:[#allocation2 + $0x7c] ss:$12 sps:$4 sm:$0xff]   ;;  %v5125_v22 = vld [vmem:[#allocation2 + $0x94] ss:$12 sps:$4 sm:$0xff]   ;;  %v5133_v26 = vld [vmem:[#allocation2 + $0x158] ss:$12 sps:$4 sm:$0xff]  }
  0x1a   :  { %4550 = vmatpush3.bf16.msra.mxu1 %v5109_v9  ;;  %v5124_v21 = vld [vmem:[#allocation2 + $0x68] ss:$12 sps:$4 sm:$0xff]   ;;  %v5128_v23 = vld [vmem:[#allocation2 + $0x140] ss:$12 sps:$4 sm:$0xff]   ;;  %v5127_v24 = vld [vmem:[#allocation2 + $0x90] ss:$12 sps:$4 sm:$0xff]  }
  0x1b   :  { %4551 = vmatprep.subr.bf16.mxu1 %v5113_v12  ;;  %v5129_v25 = vld [vmem:[#allocation2 + $0x80] ss:$12 sps:$4 sm:$0xff]   ;;  %v5132_v28 = vld [vmem:[#allocation2 + $0xa8] ss:$12 sps:$4 sm:$0xff]   ;;  %v5134_v29 = vld [vmem:[#allocation2 + $0x98] ss:$12 sps:$4 sm:$0xff]  }
  0x1c   :  { %1638 = vmatpush1.bf16.msra.mxu0 %v5107_v7  ;;  %v5130_v27 = vld [vmem:[#allocation2 + $0xac] ss:$12 sps:$4 sm:$0xff]   ;;  %v5138_v30 = vld [vmem:[#allocation2 + $0x170] ss:$12 sps:$4 sm:$0xff]   ;;  %v5145_v34 = vld [vmem:[%s6483_s0 + $0x4] ss:$36 sps:$4 sm:$0xff]  }
  0x1d   :  { %1639 = vmatprep.subr.bf16.mxu0 %v5110_v10  ;;  %v5135_v31 = vld [vmem:[#allocation2 + $0xc4] ss:$12 sps:$4 sm:$0xff]   ;;  %v5137_v32 = vld [vmem:[#allocation2 + $0xc0] ss:$12 sps:$4 sm:$0xff]   ;;  %v5146_v35 = vld [vmem:[#allocation2 + $0x248] ss:$12 sps:$4 sm:$0xff]   ;;  %1970 = vmatprep.mubr.bf16.mxu1 %v5145_v34 }
  0x1e   :  { %4552 = vmatpush3.bf16.msra.mxu1 %v5114_v13  ;;  %v5139_v33 = vld [vmem:[#allocation2 + $0xb0] ss:$12 sps:$4 sm:$0xff]   ;;  %v5142_v37 = vld [vmem:[#allocation2 + $0xd8] ss:$12 sps:$4 sm:$0xff]   ;;  %1665 = vmatprep.mubr.bf16.mxu0 %v5145_v34  ;;  %v5147_v39 = vld [vmem:[#allocation2 + $0x188] ss:$12 sps:$4 sm:$0xff]  }
  0x1f   :  { %4553 = vmatprep.subr.bf16.mxu1 %v5118_v15  ;;  %v5140_v36 = vld [vmem:[#allocation2 + $0xdc] ss:$12 sps:$4 sm:$0xff]   ;;  %v5621_v38 = vld [vmem:[%s6483_s0] ss:$36 sps:$4 sm:$0xff]   ;;  %v5153_v45 = vld [vmem:[#allocation2 + $0x10c] ss:$12 sps:$4 sm:$0xff]  }
  0x20   :  { %1640 = vmatpush1.bf16.msra.mxu0 %v5112_v11  ;;  %v5151_v40 = vld [vmem:[#allocation2 + $0x260] ss:$12 sps:$4 sm:$0xff]   ;;  %v5150_v42 = vld [vmem:[#allocation2 + $0xf0] ss:$12 sps:$4 sm:$0xff]   ;;  %v5156_v44 = vld [vmem:[#allocation2 + $0x278] ss:$12 sps:$4 sm:$0xff]  }
  0x21   :  { %1641 = vmatprep.subr.bf16.mxu0 %v5115_v14  ;;  %v5148_v41 = vld [vmem:[#allocation2 + $0xf4] ss:$12 sps:$4 sm:$0xff]   ;;  %v5157_v47 = vld [vmem:[#allocation2 + $0x1b8] ss:$12 sps:$4 sm:$0xff]   ;;  %v5161_v49 = vld [vmem:[#allocation2 + $0x290] ss:$12 sps:$4 sm:$0xff]  }
  0x22   :  { %4554 = vmatpush3.bf16.msra.mxu1 %v5119_v16  ;;  %v5152_v43 = vld [vmem:[#allocation2 + $0x1a0] ss:$12 sps:$4 sm:$0xff]   ;;  %v5155_v46 = vld [vmem:[#allocation2 + $0x108] ss:$12 sps:$4 sm:$0xff]   ;;  %v5158_v48 = vld [vmem:[#allocation2 + $0x124] ss:$12 sps:$4 sm:$0xff]  }
  0x23   :  { %4555 = vmatprep.subr.bf16.mxu1 %v5123_v19  ;;  %v5166_v50 = vld [vmem:[%s6483_s0 + $0x4c] ss:$36 sps:$4 sm:$0xff]   ;;  %v5168_v54 = vld [vmem:[#allocation2 + $0x2a8] ss:$12 sps:$4 sm:$0xff]   ;;  %v5165_v56 = vld [vmem:[#allocation2 + $0x138] ss:$12 sps:$4 sm:$0xff]  }
  0x24   :  { %1642 = vmatpush1.bf16.msra.mxu0 %v5117_v17  ;;  %v5160_v51 = vld [vmem:[#allocation2 + $0x120] ss:$12 sps:$4 sm:$0xff]   ;;  %v5162_v52 = vld [vmem:[#allocation2 + $0x1d0] ss:$12 sps:$4 sm:$0xff]   ;;  %v5170_v57 = vld [vmem:[#allocation2 + $0x1e8] ss:$12 sps:$4 sm:$0xff]  }
  0x25   :  { %1643 = vmatprep.subr.bf16.mxu0 %v5120_v18  ;;  %v5630_v53 = vld [vmem:[%s6483_s0 + $0x48] ss:$36 sps:$4 sm:$0xff]   ;;  %v5171_v58 = vld [vmem:[#allocation2 + $0x154] ss:$12 sps:$4 sm:$0xff]   ;;  %v5173_v0 = vld [vmem:[#allocation2 + $0x150] ss:$12 sps:$4 sm:$0xff]  }
  0x26   :  { %4556 = vmatpush3.bf16.msra.mxu1 %v5124_v21  ;;  %v5163_v55 = vld [vmem:[#allocation2 + $0x13c] ss:$12 sps:$4 sm:$0xff]   ;;  %v5174_v59 = vld [vmem:[#allocation2 + $0x2c0] ss:$12 sps:$4 sm:$0xff]   ;;  %v64_v60 = vld [vmem:[%s6483_s0 + $0x90] sm:$0xff]  ;;  %vm5554_vm0 = vmmov 0  }
  0x27   :  { %4557 = vmatprep.subr.bf16.mxu1 %v5128_v23  ;;  %v5636_v61 = vcombine.high %v64_v60, %v64_v60  ;;  %v5638_v62 = vcombine.low %v64_v60, %v64_v60  ;;  %v5175_v63 = vld [vmem:[#allocation2 + $0x200] ss:$12 sps:$4 sm:$0xff]   ;;  %v5180_v1 = vld [vmem:[#allocation2 + $0x2d8] ss:$12 sps:$4 sm:$0xff]   ;;  %v5178_v3 = vld [vmem:[#allocation2 + $0x168] ss:$12 sps:$4 sm:$0xff]  }
  0x28   :  { %1644 = vmatpush1.bf16.msra.mxu0 %v5122_v20  ;;  %v5176_v2 = vld [vmem:[#allocation2 + $0x16c] ss:$12 sps:$4 sm:$0xff]   ;;  %v5185_v5 = vld [vmem:[#allocation2 + $0x184] ss:$12 sps:$4 sm:$0xff]   ;;  %v5194_v10 = vld [vmem:[#allocation2 + $0x3c8] ss:$12 sps:$4 sm:$0xff]  }
  0x29   :  { %1645 = vmatprep.subr.bf16.mxu0 %v5125_v22  ;;  %v5182_v4 = vld [vmem:[#allocation2 + $0x218] ss:$12 sps:$4 sm:$0xff]   ;;  %v5186_v6 = vld [vmem:[#allocation2 + $0x2f0] ss:$12 sps:$4 sm:$0xff]   ;;  %v5183_v9 = vld [vmem:[#allocation2 + $0x180] ss:$12 sps:$4 sm:$0xff]  }
  0x2a   :  { %4558 = vmatpush3.bf16.msra.mxu1 %v5129_v25  ;;  %v5645_v7 = vld [vmem:[%s6483_s0 + $0xc] ss:$36 sps:$4 sm:$0xff]   ;;  %v5190_v11 = vld [vmem:[#allocation2 + $0x19c] ss:$12 sps:$4 sm:$0xff]   ;;  %v5188_v13 = vld [vmem:[#allocation2 + $0x198] ss:$12 sps:$4 sm:$0xff]  }
  0x2b   :  { %4559 = vmatprep.subr.bf16.mxu1 %v5133_v26  ;;  %v5187_v8 = vld [vmem:[#allocation2 + $0x230] ss:$12 sps:$4 sm:$0xff]   ;;  %v5651_v12 = vld [vmem:[%s6483_s0 + $0x8] ss:$36 sps:$4 sm:$0xff]   ;;  %v5198_v16 = vld [vmem:[#allocation2 + $0x1b4] ss:$12 sps:$4 sm:$0xff]  }
  0x2c   :  { %1646 = vmatpush1.bf16.msra.mxu0 %v5127_v24  ;;  %v5195_v14 = vld [vmem:[#allocation2 + $0x308] ss:$12 sps:$4 sm:$0xff]   ;;  %v5199_v15 = vld [vmem:[#allocation2 + $0x3e0] ss:$12 sps:$4 sm:$0xff]   ;;  %v5196_v17 = vld [vmem:[#allocation2 + $0x1b0] ss:$12 sps:$4 sm:$0xff]  }
  0x2d   :  { %1647 = vmatprep.subr.bf16.mxu0 %v5130_v27  ;;  %v5200_v18 = vld [vmem:[#allocation2 + $0x320] ss:$12 sps:$4 sm:$0xff]   ;;  %v5204_v19 = vld [vmem:[#allocation2 + $0x3f8] ss:$12 sps:$4 sm:$0xff]   ;;  %v5201_v21 = vld [vmem:[#allocation2 + $0x1c8] ss:$12 sps:$4 sm:$0xff]  }
  0x2e   :  { %4560 = vmatpush3.bf16.msra.mxu1 %v5134_v29  ;;  %v5203_v20 = vld [vmem:[#allocation2 + $0x1cc] ss:$12 sps:$4 sm:$0xff]   ;;  %v5209_v24 = vld [vmem:[#allocation2 + $0x410] ss:$12 sps:$4 sm:$0xff]   ;;  %v5216_v29 = vld [vmem:[#allocation2 + $0x428] ss:$12 sps:$4 sm:$0xff]  }
  0x2f   :  { %4561 = vmatprep.subr.bf16.mxu1 %v5138_v30  ;;  %v5205_v22 = vld [vmem:[#allocation2 + $0x338] ss:$12 sps:$4 sm:$0xff]   ;;  %v5664_v25 = vld [vmem:[%s6483_s0 + $0x50] ss:$36 sps:$4 sm:$0xff]   ;;  %v5206_v27 = vld [vmem:[#allocation2 + $0x1e0] ss:$12 sps:$4 sm:$0xff]  }
  0x30   :  { %1648 = vmatpush1.bf16.msra.mxu0 %v5132_v28  ;;  %v5658_v23 = vld [vmem:[%s6483_s0 + $0x54] ss:$36 sps:$4 sm:$0xff]   ;;  %v5208_v26 = vld [vmem:[#allocation2 + $0x1e4] ss:$12 sps:$4 sm:$0xff]   ;;  %v5213_v30 = vld [vmem:[#allocation2 + $0x1fc] ss:$12 sps:$4 sm:$0xff]  }
  0x31   :  { %1649 = vmatprep.subr.bf16.mxu0 %v5135_v31  ;;  %v5210_v28 = vld [vmem:[#allocation2 + $0x350] ss:$12 sps:$4 sm:$0xff]   ;;  %v5211_v31 = vld [vmem:[#allocation2 + $0x1f8] ss:$12 sps:$4 sm:$0xff]   ;;  %vm2238_vm1 = vcmask 523264   ;;  %vm2304_vm2 = vcmask 1040384  }
  0x32   :  { %4562 = vmatpush3.bf16.msra.mxu1 %v5139_v33  ;;  %v5218_v33 = vld [vmem:[#allocation2 + $0x368] ss:$12 sps:$4 sm:$0xff]   ;;  %v5695_v60 = vld [vmem:[%s6483_s0 + $0x5c] ss:$36 sps:$4 sm:$0xff]   ;;  %vm2534_vm3 = vcmask 130048  }
  0x33   :  { %4581 = vmatprep.subr.bf16.mxu1 %v5146_v35 }
  0x34   :  { %1650 = vmatpush1.bf16.msra.mxu0 %v5137_v32  ;;  %v65_v32 = vld [vmem:[%s6483_s0 + $0x98] sm:$0xff] }
  0x35   :  { %1651 = vmatprep.subr.bf16.mxu0 %v5140_v36  ;;  %1971 = vmatmul.mubr.bf16.vlgmr.msra.gmra.mrb[0].mxu1 %v5621_v38  ;;  %v5672_v34 = vcombine.high %v65_v32, %v65_v32  ;;  %v5674_v35 = vcombine.low %v65_v32, %v65_v32  ;;  %v5222_v36 = vld [vmem:[#allocation2 + $0x440] ss:$12 sps:$4 sm:$0xff]   ;;  %v5553_v32 = vmov 0.0  }
  0x36   :  { %4582 = vmatpush3.bf16.msra.mxu1 %v5147_v39  ;;  %1978 = vmatprep.mubr.bf16.mxu1 %v5166_v50  ;;  %v5223_v39 = vld [vmem:[#allocation2 + $0x380] ss:$12 sps:$4 sm:$0xff]  }
  0x37   :  { %4583 = vmatprep.subr.bf16.mxu1 %v5151_v40  ;;  %v5228_v40 = vld [vmem:[#allocation2 + $0x458] ss:$12 sps:$4 sm:$0xff]  }
  0x38   :  { %1652 = vmatpush1.bf16.msra.mxu0 %v5142_v37  ;;  %v5221_v37 = vld [vmem:[#allocation2 + $0x214] ss:$12 sps:$4 sm:$0xff]  }
  0x39   :  { %1653 = vmatprep.subr.bf16.mxu0 %v5148_v41  ;;  %v5226_v41 = vld [vmem:[#allocation2 + $0x22c] ss:$12 sps:$4 sm:$0xff]  }
  0x3a   :  { %4584 = vmatpush3.bf16.msra.mxu1 %v5152_v43  ;;  %v5683_v43 = vld [vmem:[%s6483_s0 + $0x14] ss:$36 sps:$4 sm:$0xff]  }
  0x3b   :  { %4585 = vmatprep.subr.bf16.mxu1 %v5156_v44  ;;  %v5230_v44 = vld [vmem:[#allocation2 + $0x398] ss:$12 sps:$4 sm:$0xff]  }
  0x3c   :  { %1654 = vmatpush1.bf16.msra.mxu0 %v5150_v42  ;;  %v5224_v42 = vld [vmem:[#allocation2 + $0x228] ss:$12 sps:$4 sm:$0xff]  }
  0x3d   :  { %1655 = vmatprep.subr.bf16.mxu0 %v5153_v45  ;;  %1979 = vmatmul.mubr.bf16.gmra.mrb[4].mxu1 %v5630_v53  ;;  %v5234_v45 = vld [vmem:[#allocation2 + $0x470] ss:$12 sps:$4 sm:$0xff]  }
  0x3e   :  { %4586 = vmatpush3.bf16.msra.mxu1 %v5157_v47  ;;  %1986 = vmatprep.mubr.bf16.mxu1 %v5636_v61  ;;  %v5231_v47 = vld [vmem:[#allocation2 + $0x240] ss:$12 sps:$4 sm:$0xff]  }
  0x3f   :  { %4587 = vmatprep.subr.bf16.mxu1 %v5161_v49  ;;  %v5242_v49 = vld [vmem:[#allocation2 + $0x548] ss:$12 sps:$4 sm:$0xff]  }
  0x40   :  { %1656 = vmatpush1.bf16.msra.mxu0 %v5155_v46  ;;  %v5233_v46 = vld [vmem:[#allocation2 + $0x244] ss:$12 sps:$4 sm:$0xff]  }
  0x41   :  { %1657 = vmatprep.subr.bf16.mxu0 %v5158_v48  ;;  %v5235_v48 = vld [vmem:[#allocation2 + $0x3b0] ss:$12 sps:$4 sm:$0xff]  }
  0x42   :  { %4588 = vmatpush3.bf16.msra.mxu1 %v5162_v52  ;;  %v5243_v52 = vld [vmem:[#allocation2 + $0x488] ss:$12 sps:$4 sm:$0xff]  }
  0x43   :  { %4589 = vmatprep.subr.bf16.mxu1 %v5168_v54  ;;  %v5247_v54 = vld [vmem:[#allocation2 + $0x560] ss:$12 sps:$4 sm:$0xff]  }
  0x44   :  { %1658 = vmatpush1.bf16.msra.mxu0 %v5160_v51  ;;  %v5689_v51 = vld [vmem:[%s6483_s0 + $0x10] ss:$36 sps:$4 sm:$0xff]  }
  0x45   :  { %1659 = vmatprep.subr.bf16.mxu0 %v5163_v55  ;;  %1987 = vmatmul.mubr.bf16.gmra.mrb[8].mxu1 %v5638_v62  ;;  %v5246_v55 = vld [vmem:[#allocation2 + $0x274] ss:$12 sps:$4 sm:$0xff]  }
  0x46   :  { %4590 = vmatpush3.bf16.msra.mxu1 %v5170_v57  ;;  %2026 = vmatprep.mubr.bf16.mxu1 %v5645_v7  ;;  %v5248_v57 = vld [vmem:[#allocation2 + $0x4a0] ss:$12 sps:$4 sm:$0xff]  }
  0x47   :  { %4591 = vmatprep.subr.bf16.mxu1 %v5174_v59  ;;  %v5252_v59 = vld [vmem:[#allocation2 + $0x578] ss:$12 sps:$4 sm:$0xff]  }
  0x48   :  { %1660 = vmatpush1.bf16.msra.mxu0 %v5165_v56  ;;  %v5244_v56 = vld [vmem:[#allocation2 + $0x270] ss:$12 sps:$4 sm:$0xff]  }
  0x49   :  { %1661 = vmatprep.subr.bf16.mxu0 %v5171_v58  ;;  %v5251_v58 = vld [vmem:[#allocation2 + $0x28c] ss:$12 sps:$4 sm:$0xff]  }
  0x4a   :  { %4592 = vmatpush3.bf16.msra.mxu1 %v5175_v63  ;;  %v5249_v63 = vld [vmem:[#allocation2 + $0x288] ss:$12 sps:$4 sm:$0xff]  }
  0x4b   :  { %4593 = vmatprep.subr.bf16.mxu1 %v5180_v1  ;;  %v5256_v1 = vld [vmem:[#allocation2 + $0x2a4] ss:$12 sps:$4 sm:$0xff]  }
  0x4c   :  { %1662 = vmatpush1.bf16.msra.mxu0 %v5173_v0  ;;  %v5257_v0 = vld [vmem:[#allocation2 + $0x590] ss:$12 sps:$4 sm:$0xff]  }
  0x4d   :  { %1663 = vmatprep.subr.bf16.mxu0 %v5176_v2  ;;  %v5254_v2 = vld [vmem:[#allocation2 + $0x2a0] ss:$12 sps:$4 sm:$0xff]  }
  0x4e   :  { %4594 = vmatpush3.bf16.msra.mxu1 %v5182_v4  ;;  %v5264_v4 = vld [vmem:[#allocation2 + $0x5a8] ss:$12 sps:$4 sm:$0xff]  }
  0x4f   :  { %4595 = vmatprep.subr.bf16.mxu1 %v5186_v6  ;;  %v5261_v6 = vld [vmem:[#allocation2 + $0x2bc] ss:$12 sps:$4 sm:$0xff]  }
  0x50   :  { %1664 = vmatpush1.bf16.msra.mxu0 %v5178_v3  ;;  %v5258_v3 = vld [vmem:[#allocation2 + $0x4d0] ss:$12 sps:$4 sm:$0xff]  }
  0x51   :  { %1694 = vmatprep.subr.bf16.mxu0 %v5185_v5  ;;  %v66_v5 = vld [vmem:[%s6483_s0 + $0xa0] sm:$0xff] }
  0x52   :  { %4596 = vmatpush3.bf16.msra.mxu1 %v5187_v8  ;;  %v5709_v8 = vcombine.low %v66_v5, %v66_v5 }
  0x53   :  { %1666 = vmatmul.mubr.bf16.vlgmr.msra.gmra.mrb[0].mxu0 %v5621_v38  ;;  %4615 = vmatprep.subr.bf16.mxu1 %v5194_v10  ;;  %v5219_v38 = vld [vmem:[#allocation2 + $0x210] ss:$12 sps:$4 sm:$0xff]   ;;  %v5266_v10 = vld [vmem:[#allocation2 + $0x4e8] ss:$12 sps:$4 sm:$0xff]  }
  0x54   :  { %1695 = vmatpush1.bf16.msra.mxu0 %v5183_v9  ;;  %1675 = vmatprep.mubr.bf16.mxu0 %v5166_v50  ;;  %v5238_v50 = vld [vmem:[#allocation2 + $0x25c] ss:$12 sps:$4 sm:$0xff]   ;;  %v5259_v9 = vld [vmem:[#allocation2 + $0x2b8] ss:$12 sps:$4 sm:$0xff]  }
  0x55   :  { %1696 = vmatprep.subr.bf16.mxu0 %v5190_v11  ;;  %2027 = vmatmul.mubr.bf16.vlgmr.msra.gmra.mrb[12].mxu1 %v5651_v12  ;;  %v5270_v11 = vld [vmem:[#allocation2 + $0x5c0] ss:$12 sps:$4 sm:$0xff]  }
  0x56   :  { %4616 = vmatpush3.bf16.msra.mxu1 %v5195_v14  ;;  %2034 = vmatprep.mubr.bf16.mxu1 %v5658_v23  ;;  %v5267_v14 = vld [vmem:[#allocation2 + $0x2d0] ss:$12 sps:$4 sm:$0xff]  }
  0x57   :  { %4617 = vmatprep.subr.bf16.mxu1 %v5199_v15  ;;  %v5271_v15 = vld [vmem:[#allocation2 + $0x500] ss:$12 sps:$4 sm:$0xff]  }
  0x58   :  { %1697 = vmatpush1.bf16.msra.mxu0 %v5188_v13  ;;  %v5269_v13 = vld [vmem:[#allocation2 + $0x2d4] ss:$12 sps:$4 sm:$0xff]  }
  0x59   :  { %1698 = vmatprep.subr.bf16.mxu0 %v5198_v16  ;;  %v5276_v16 = vld [vmem:[#allocation2 + $0x5d8] ss:$12 sps:$4 sm:$0xff]  }
  0x5a   :  { %4618 = vmatpush3.bf16.msra.mxu1 %v5200_v18  ;;  %v5274_v18 = vld [vmem:[#allocation2 + $0x2ec] ss:$12 sps:$4 sm:$0xff]  }
  0x5b   :  { %1676 = vmatmul.mubr.bf16.gmra.mrb[4].mxu0 %v5630_v53  ;;  %4619 = vmatprep.subr.bf16.mxu1 %v5204_v19  ;;  %v5236_v53 = vld [vmem:[#allocation2 + $0x258] ss:$12 sps:$4 sm:$0xff]   ;;  %v5272_v19 = vld [vmem:[#allocation2 + $0x2e8] ss:$12 sps:$4 sm:$0xff]  }
  0x5c   :  { %1699 = vmatpush1.bf16.msra.mxu0 %v5196_v17  ;;  %1685 = vmatprep.mubr.bf16.mxu0 %v5636_v61  ;;  %v5700_v61 = vld [vmem:[%s6483_s0 + $0x58] ss:$36 sps:$4 sm:$0xff]  }
  0x5d   :  { %1700 = vmatprep.subr.bf16.mxu0 %v5203_v20  ;;  %2035 = vmatmul.mubr.bf16.gmra.mrb[16].mxu1 %v5664_v25  ;;  %v5716_v17 = vld [vmem:[%s6483_s0 + $0x1c] ss:$36 sps:$4 sm:$0xff]   ;;  %v5278_v20 = vld [vmem:[#allocation2 + $0x518] ss:$12 sps:$4 sm:$0xff]  }
  0x5e   :  { %4620 = vmatpush3.bf16.msra.mxu1 %v5205_v22  ;;  %2042 = vmatprep.mubr.bf16.mxu1 %v5672_v34  ;;  %v5281_v22 = vld [vmem:[#allocation2 + $0x304] ss:$12 sps:$4 sm:$0xff]  }
  0x5f   :  { %4621 = vmatprep.subr.bf16.mxu1 %v5209_v24  ;;  %v5283_v24 = vld [vmem:[#allocation2 + $0x530] ss:$12 sps:$4 sm:$0xff]  }
  0x60   :  { %1701 = vmatpush1.bf16.msra.mxu0 %v5201_v21  ;;  %v5282_v21 = vld [vmem:[#allocation2 + $0x5f0] ss:$12 sps:$4 sm:$0xff]  }
  0x61   :  { %1702 = vmatprep.subr.bf16.mxu0 %v5208_v26  ;;  %v5279_v26 = vld [vmem:[#allocation2 + $0x300] ss:$12 sps:$4 sm:$0xff]  }
  0x62   :  { %4622 = vmatpush3.bf16.msra.mxu1 %v5210_v28  ;;  %v5722_v28 = vld [vmem:[%s6483_s0 + $0x18] ss:$36 sps:$4 sm:$0xff]  }
  0x63   :  { %1686 = vmatmul.mubr.bf16.gmra.mrb[8].mxu0 %v5638_v62  ;;  %4623 = vmatprep.subr.bf16.mxu1 %v5216_v29  ;;  %v5253_v62 = vld [vmem:[#allocation2 + $0x4b8] ss:$12 sps:$4 sm:$0xff]   ;;  %v5290_v29 = vld [vmem:[#allocation2 + $0x608] ss:$12 sps:$4 sm:$0xff]  }
  0x64   :  { %1703 = vmatpush1.bf16.msra.mxu0 %v5206_v27  ;;  %1726 = vmatprep.mubr.bf16.mxu0 %v5645_v7  ;;  %v5707_v7 = vcombine.high %v66_v5, %v66_v5  ;;  %v5286_v27 = vld [vmem:[#allocation2 + $0x31c] ss:$12 sps:$4 sm:$0xff]   ;;  %v5781_v5 = vld [vmem:[%s6483_s0 + $0xb0] ss:$0 sps:$4 sm:$0xff]  }
  0x65   :  { %1704 = vmatprep.subr.bf16.mxu0 %v5213_v30  ;;  %2043 = vmatmul.mubr.bf16.gmra.mrb[20].mxu1 %v5674_v35  ;;  %v5728_v30 = vld [vmem:[%s6483_s0 + $0x64] ss:$36 sps:$4 sm:$0xff]  }
  0x66   :  { %4624 = vmatpush3.bf16.msra.mxu1 %v5218_v33  ;;  %2082 = vmatprep.mubr.bf16.mxu1 %v5683_v43  ;;  %v5293_v33 = vld [vmem:[#allocation2 + $0x334] ss:$12 sps:$4 sm:$0xff]  }
  0x67   :  { %4625 = vmatprep.subr.bf16.mxu1 %v5222_v36  ;;  %v5291_v36 = vld [vmem:[#allocation2 + $0x330] ss:$12 sps:$4 sm:$0xff]  }
  0x68   :  { %1705 = vmatpush1.bf16.msra.mxu0 %v5211_v31  ;;  %v5284_v31 = vld [vmem:[#allocation2 + $0x318] ss:$12 sps:$4 sm:$0xff]  }
  0x69   :  { %1706 = vmatprep.subr.bf16.mxu0 %v5221_v37  ;;  %v67_v37 = vld [vmem:[%s6483_s0 + $0xa8] sm:$0xff] }
  0x6a   :  { %4626 = vmatpush3.bf16.msra.mxu1 %v5223_v39  ;;  %v5298_v39 = vld [vmem:[#allocation2 + $0x638] ss:$12 sps:$4 sm:$0xff]  }
  0x6b   :  { %4627 = vmatprep.subr.bf16.mxu1 %v5228_v40  ;;  %v5743_v40 = vcombine.high %v67_v37, %v67_v37 }
  0x6c   :  { %1707 = vmatpush1.bf16.msra.mxu0 %v5219_v38  ;;  %v5297_v38 = vld [vmem:[#allocation2 + $0x34c] ss:$12 sps:$4 sm:$0xff]  }
  0x6d   :  { %1708 = vmatprep.subr.bf16.mxu0 %v5226_v41  ;;  %v5295_v41 = vld [vmem:[#allocation2 + $0x348] ss:$12 sps:$4 sm:$0xff]  }
  0x6e   :  { %4628 = vmatpush3.bf16.msra.mxu1 %v5230_v44  ;;  %v5302_v44 = vld [vmem:[#allocation2 + $0x650] ss:$12 sps:$4 sm:$0xff]  }
  0x6f   :  { %4629 = vmatprep.subr.bf16.mxu1 %v5234_v45  ;;  %v5299_v45 = vld [vmem:[#allocation2 + $0x360] ss:$12 sps:$4 sm:$0xff]  }
  0x70   :  { %1709 = vmatpush1.bf16.msra.mxu0 %v5224_v42  ;;  %v5301_v42 = vld [vmem:[#allocation2 + $0x364] ss:$12 sps:$4 sm:$0xff]  }
  0x71   :  { %1710 = vmatprep.subr.bf16.mxu0 %v5233_v46  ;;  %v5751_v46 = vcombine.low %v67_v37, %v67_v37  ;;  %v5380_v37 = vld [vmem:[#allocation2 + $0x574] ss:$12 sps:$4 sm:$0xff]  }
  0x72   :  { %4630 = vmatpush3.bf16.msra.mxu1 %v5235_v48  ;;  %v5312_v48 = vld [vmem:[#allocation2 + $0x394] ss:$12 sps:$4 sm:$0xff]  }
  0x73   :  { %4649 = vmatprep.subr.bf16.mxu1 %v5242_v49  ;;  %v5313_v49 = vld [vmem:[#allocation2 + $0x680] ss:$12 sps:$4 sm:$0xff]  }
  0x74   :  { %1711 = vmatpush1.bf16.msra.mxu0 %v5231_v47  ;;  %v5309_v47 = vld [vmem:[#allocation2 + $0x668] ss:$12 sps:$4 sm:$0xff]  }
  0x75   :  { %1712 = vmatprep.subr.bf16.mxu0 %v5238_v50  ;;  %2083 = vmatmul.mubr.bf16.vlgmr.msra.gmra.mrb[24].mxu1 %v5689_v51  ;;  %v5310_v50 = vld [vmem:[#allocation2 + $0x390] ss:$12 sps:$4 sm:$0xff]  }
  0x76   :  { %4650 = vmatpush3.bf16.msra.mxu1 %v5243_v52  ;;  %2090 = vmatprep.mubr.bf16.mxu1 %v5695_v60  ;;  %v5319_v52 = vld [vmem:[#allocation2 + $0x698] ss:$12 sps:$4 sm:$0xff]  }
  0x77   :  { %4651 = vmatprep.subr.bf16.mxu1 %v5247_v54  ;;  %v5323_v54 = vld [vmem:[#allocation2 + $0x6b0] ss:$12 sps:$4 sm:$0xff]  }
  0x78   :  { %1713 = vmatpush1.bf16.msra.mxu0 %v5236_v53  ;;  %v5314_v53 = vld [vmem:[#allocation2 + $0x3a8] ss:$12 sps:$4 sm:$0xff]  }
  0x79   :  { %1714 = vmatprep.subr.bf16.mxu0 %v5246_v55  ;;  %v5320_v55 = vld [vmem:[#allocation2 + $0x3c0] ss:$12 sps:$4 sm:$0xff]  }
  0x7a   :  { %4652 = vmatpush3.bf16.msra.mxu1 %v5248_v57  ;;  %v5765_v57 = vld [vmem:[%s6483_s0 + $0x20] ss:$36 sps:$4 sm:$0xff]  }
  0x7b   :  { %4653 = vmatprep.subr.bf16.mxu1 %v5252_v59  ;;  %v5330_v59 = vld [vmem:[#allocation2 + $0x3f4] ss:$12 sps:$4 sm:$0xff]  }
  0x7c   :  { %1715 = vmatpush1.bf16.msra.mxu0 %v5244_v56  ;;  %v5326_v56 = vld [vmem:[#allocation2 + $0x3dc] ss:$12 sps:$4 sm:$0xff]  }
  0x7d   :  { %1716 = vmatprep.subr.bf16.mxu0 %v5251_v58  ;;  %2091 = vmatmul.mubr.bf16.gmra.mrb[28].mxu1 %v5700_v61  ;;  %v5324_v58 = vld [vmem:[#allocation2 + $0x3d8] ss:$12 sps:$4 sm:$0xff]  }
  0x7e   :  { %4654 = vmatpush3.bf16.msra.mxu1 %v5253_v62  ;;  %2098 = vmatprep.mubr.bf16.mxu1 %v5707_v7  ;;  %v5328_v62 = vld [vmem:[#allocation2 + $0x3f0] ss:$12 sps:$4 sm:$0xff]  }
  0x7f   :  { %4655 = vmatprep.subr.bf16.mxu1 %v5257_v0  ;;  %v5773_v0 = vld [vmem:[%s6483_s0 + $0x68] ss:$36 sps:$4 sm:$0xff]  }
  0x80   :  { %1717 = vmatpush1.bf16.msra.mxu0 %v5249_v63  ;;  %v5333_v63 = vld [vmem:[#allocation2 + $0x40c] ss:$12 sps:$4 sm:$0xff]  }
  0x81   :  { %1718 = vmatprep.subr.bf16.mxu0 %v5256_v1  ;;  %v5331_v1 = vld [vmem:[#allocation2 + $0x408] ss:$12 sps:$4 sm:$0xff]  }
  0x82   :  { %4656 = vmatpush3.bf16.msra.mxu1 %v5258_v3  ;;  %v5335_v3 = vld [vmem:[#allocation2 + $0x420] ss:$12 sps:$4 sm:$0xff]  }
  0x83   :  { %4657 = vmatprep.subr.bf16.mxu1 %v5264_v4  ;;  %v5340_v4 = vld [vmem:[#allocation2 + $0x43c] ss:$12 sps:$4 sm:$0xff]  }
  0x84   :  { %1719 = vmatpush1.bf16.msra.mxu0 %v5254_v2  ;;  %v5337_v2 = vld [vmem:[#allocation2 + $0x424] ss:$12 sps:$4 sm:$0xff]  }
  0x85   :  { %1720 = vmatprep.subr.bf16.mxu0 %v5261_v6  ;;  %2099 = vmatmul.mubr.bf16.gmra.mrb[32].mxu1 %v5709_v8  ;;  %v5338_v6 = vld [vmem:[#allocation2 + $0x438] ss:$12 sps:$4 sm:$0xff]  }
  0x86   :  { %4658 = vmatpush3.bf16.msra.mxu1 %v5266_v10  ;;  %2138 = vmatprep.mubr.bf16.mxu1 %v5716_v17  ;;  %v5342_v10 = vld [vmem:[#allocation2 + $0x450] ss:$12 sps:$4 sm:$0xff]  }
  0x87   :  { %4659 = vmatprep.subr.bf16.mxu1 %v5270_v11  ;;  %v5347_v11 = vld [vmem:[#allocation2 + $0x46c] ss:$12 sps:$4 sm:$0xff]  }
  0x88   :  { %1721 = vmatpush1.bf16.msra.mxu0 %v5259_v9  ;;  %v5344_v9 = vld [vmem:[#allocation2 + $0x454] ss:$12 sps:$4 sm:$0xff]  }
  0x89   :  { %1722 = vmatprep.subr.bf16.mxu0 %v5269_v13  ;;  %v5345_v13 = vld [vmem:[#allocation2 + $0x468] ss:$12 sps:$4 sm:$0xff]  }
  0x8a   :  { %4660 = vmatpush3.bf16.msra.mxu1 %v5271_v15  ;;  %v5348_v15 = vld [vmem:[#allocation2 + $0x480] ss:$12 sps:$4 sm:$0xff]  }
  0x8b   :  { %4661 = vmatprep.subr.bf16.mxu1 %v5276_v16  ;;  %v5353_v16 = vld [vmem:[#allocation2 + $0x49c] ss:$12 sps:$4 sm:$0xff]  }
  0x8c   :  { %1723 = vmatpush1.bf16.msra.mxu0 %v5267_v14  ;;  %v5350_v14 = vld [vmem:[#allocation2 + $0x484] ss:$12 sps:$4 sm:$0xff]  }
  0x8d   :  { %1724 = vmatprep.subr.bf16.mxu0 %v5274_v18  ;;  %v5351_v18 = vld [vmem:[#allocation2 + $0x498] ss:$12 sps:$4 sm:$0xff]  }
  0x8e   :  { %4662 = vmatpush3.bf16.msra.mxu1 %v5278_v20  ;;  %v5354_v20 = vld [vmem:[#allocation2 + $0x4b0] ss:$12 sps:$4 sm:$0xff]  }
  0x8f   :  { %4663 = vmatprep.subr.bf16.mxu1 %v5282_v21  ;;  %v5359_v21 = vld [vmem:[#allocation2 + $0x4cc] ss:$12 sps:$4 sm:$0xff]  }
  0x90   :  { %1725 = vmatpush1.bf16.msra.mxu0 %v5272_v19  ;;  %v5356_v19 = vld [vmem:[#allocation2 + $0x4b4] ss:$12 sps:$4 sm:$0xff]  }
  0x91   :  { %1755 = vmatprep.subr.bf16.mxu0 %v5281_v22  ;;  %v5357_v22 = vld [vmem:[#allocation2 + $0x4c8] ss:$12 sps:$4 sm:$0xff]  }
  0x92   :  { %4664 = vmatpush3.bf16.msra.mxu1 %v5283_v24  ;;  %v5362_v24 = vld [vmem:[#allocation2 + $0x4e4] ss:$12 sps:$4 sm:$0xff]  }
  0x93   :  { %1727 = vmatmul.mubr.bf16.vlgmr.msra.gmra.mrb[0].mxu0 %v5651_v12  ;;  %4876 = vmatprep.subr.bf16.mxu1 %v5553_v32  ;;  %v5294_v12 = vld [vmem:[#allocation2 + $0x620] ss:$12 sps:$4 sm:$0xff]  }
  0x94   :  { %1756 = vmatpush1.bf16.msra.mxu0 %v5279_v26  ;;  %1736 = vmatprep.mubr.bf16.mxu0 %v5658_v23  ;;  %v5741_v23 = vld [vmem:[%s6483_s0 + $0x60] ss:$36 sps:$4 sm:$0xff]  }
  0x95   :  { %1757 = vmatprep.subr.bf16.mxu0 %v5286_v27  ;;  %2139 = vmatmul.mubr.bf16.vlgmr.msra.gmra.mrb[36].mxu1 %v5722_v28  ;;  %v5360_v26 = vld [vmem:[#allocation2 + $0x4e0] ss:$12 sps:$4 sm:$0xff]   ;;  %v5365_v27 = vld [vmem:[#allocation2 + $0x4fc] ss:$12 sps:$4 sm:$0xff]  }
  0x96   :  { %4877 = vmatpush3.bf16.msra.mxu1 %v5290_v29  ;;  %2146 = vmatprep.mubr.bf16.mxu1 %v5728_v30  ;;  %v5368_v29 = vld [vmem:[#allocation2 + $0x514] ss:$12 sps:$4 sm:$0xff]  }
  0x97   :  { %4878 = vmatprep.subr.bf16.mxu1 %v5553_v32 }
  0x98   :  { %1758 = vmatpush1.bf16.msra.mxu0 %v5284_v31  ;;  %v5371_v31 = vld [vmem:[#allocation2 + $0x52c] ss:$12 sps:$4 sm:$0xff]  }
  0x99   :  { %1759 = vmatprep.subr.bf16.mxu0 %v5293_v33  ;;  %v5374_v33 = vld [vmem:[#allocation2 + $0x544] ss:$12 sps:$4 sm:$0xff]  }
  0x9a   :  { %4879 = vmatpush3.bf16.msra.mxu1 %v5294_v12  ;;  %v5375_v12 = vld [vmem:[#allocation2 + $0x558] ss:$12 sps:$4 sm:$0xff]  }
  0x9b   :  { %1737 = vmatmul.mubr.bf16.gmra.mrb[4].mxu0 %v5664_v25  ;;  %4880 = vmatprep.subr.bf16.mxu1 %v5553_v32  ;;  %v5305_v25 = vld [vmem:[#allocation2 + $0x37c] ss:$12 sps:$4 sm:$0xff]  }
  0x9c   :  { %1760 = vmatpush1.bf16.msra.mxu0 %v5291_v36  ;;  %1746 = vmatprep.mubr.bf16.mxu0 %v5672_v34  ;;  %v5303_v34 = vld [vmem:[#allocation2 + $0x378] ss:$12 sps:$4 sm:$0xff]   ;;  %v5377_v36 = vld [vmem:[#allocation2 + $0x55c] ss:$12 sps:$4 sm:$0xff]  }
  0x9d   :  { %1761 = vmatprep.subr.bf16.mxu0 %v5297_v38  ;;  %2147 = vmatmul.mubr.bf16.gmra.mrb[40].mxu1 %v5741_v23  ;;  %v5383_v38 = vld [vmem:[#allocation2 + $0x58c] ss:$12 sps:$4 sm:$0xff]  }
  0x9e   :  { %4881 = vmatpush3.bf16.msra.mxu1 %v5298_v39  ;;  %2154 = vmatprep.mubr.bf16.mxu1 %v5743_v40  ;;  %v5386_v39 = vld [vmem:[#allocation2 + $0x5a4] ss:$12 sps:$4 sm:$0xff]  }
  0x9f   :  { %4882 = vmatprep.subr.bf16.mxu1 %v5553_v32 }
  0xa0   :  { %1762 = vmatpush1.bf16.msra.mxu0 %v5295_v41  ;;  %v5384_v41 = vld [vmem:[#allocation2 + $0x5a0] ss:$12 sps:$4 sm:$0xff]  }
  0xa1   :  { %1763 = vmatprep.subr.bf16.mxu0 %v5301_v42  ;;  %v5389_v42 = vld [vmem:[#allocation2 + $0x5bc] ss:$12 sps:$4 sm:$0xff]  }
  0xa2   :  { %4883 = vmatpush3.bf16.msra.mxu1 %v5302_v44  ;;  %v5387_v44 = vld [vmem:[#allocation2 + $0x5b8] ss:$12 sps:$4 sm:$0xff]  }
  0xa3   :  { %1747 = vmatmul.mubr.bf16.gmra.mrb[8].mxu0 %v5674_v35  ;;  %4884 = vmatprep.subr.bf16.mxu1 %v5553_v32  ;;  %v5316_v35 = vld [vmem:[#allocation2 + $0x3ac] ss:$12 sps:$4 sm:$0xff]  }
  0xa4   :  { %1764 = vmatpush1.bf16.msra.mxu0 %v5299_v45  ;;  %1787 = vmatprep.mubr.bf16.mxu0 %v5683_v43  ;;  %v5322_v43 = vld [vmem:[#allocation2 + $0x3c4] ss:$12 sps:$4 sm:$0xff]   ;;  %v5392_v45 = vld [vmem:[#allocation2 + $0x5d4] ss:$12 sps:$4 sm:$0xff]  }
  0xa5   :  { %1765 = vmatprep.subr.bf16.mxu0 %v5305_v25  ;;  %2155 = vmatmul.mubr.bf16.gmra.mrb[44].mxu1 %v5751_v46  ;;  %v5390_v25 = vld [vmem:[#allocation2 + $0x5d0] ss:$12 sps:$4 sm:$0xff]  }
  0xa6   :  { %4885 = vmatpush3.bf16.msra.mxu1 %v5309_v47  ;;  %4892 = vmatprep.mubr.msk.bf16.mxu1 %vm5554_vm0, %v5553_v32  ;;  %v5395_v47 = vld [vmem:[#allocation2 + $0x5ec] ss:$12 sps:$4 sm:$0xff]  }
  0xa7   :  { %4886 = vmatprep.subr.bf16.mxu1 %v5553_v32 }
  0xa8   :  { %1766 = vmatpush1.bf16.msra.mxu0 %v5303_v34 }
  0xa9   :  { %1767 = vmatprep.subr.bf16.mxu0 %v5312_v48 }
  0xaa   :  { %4887 = vmatpush3.bf16.msra.mxu1 %v5313_v49 }
  0xab   :  { %4888 = vmatprep.subr.bf16.mxu1 %v5553_v32 }
  0xac   :  { %1768 = vmatpush1.bf16.msra.mxu0 %v5310_v50 }
  0xad   :  { %1769 = vmatprep.subr.bf16.mxu0 %v5316_v35  ;;  %v5393_v35 = vld [vmem:[#allocation2 + $0x5e8] ss:$12 sps:$4 sm:$0xff]  }
  0xae   :  { %4889 = vmatpush3.bf16.msra.mxu1 %v5319_v52 }
  0xaf   :  { %4890 = vmatprep.subr.bf16.mxu1 %v5553_v32 }
  0xb0   :  { %1770 = vmatpush1.bf16.msra.mxu0 %v5314_v53  ;;  %v5398_v53 = vld [vmem:[#allocation2 + $0x604] ss:$12 sps:$4 sm:$0xff]  }
  0xb1   :  { %1771 = vmatprep.subr.bf16.mxu0 %v5322_v43 }
  0xb2   :  { %4891 = vmatpush3.bf16.msra.mxu1 %v5323_v54  ;;  %v5396_v54 = vld [vmem:[#allocation2 + $0x600] ss:$12 sps:$4 sm:$0xff]  }
  0xb4   :  { %1772 = vmatpush1.bf16.msra.mxu0 %v5320_v55  ;;  %v5401_v55 = vld [vmem:[#allocation2 + $0x61c] ss:$12 sps:$4 sm:$0xff]  }
  0xb5   :  { %1773 = vmatprep.subr.bf16.mxu0 %v5326_v56  ;;  %4893 = vmatmul.mubr.bf16.vlgmr.msra.gmra.mrb[48].mxu1 %v5765_v57  ;;  %v5399_v56 = vld [vmem:[#allocation2 + $0x618] ss:$12 sps:$4 sm:$0xff]  }
  0xb6   :  { %4896 = vmatprep.mubr.msk.bf16.mxu1 %vm5554_vm0, %v5553_v32 }
  0xb8   :  { %1774 = vmatpush1.bf16.msra.mxu0 %v5324_v58 }
  0xb9   :  { %1775 = vmatprep.subr.bf16.mxu0 %v5330_v59  ;;  %v5404_v59 = vld [vmem:[#allocation2 + $0x634] ss:$12 sps:$4 sm:$0xff]  }
  0xbc   :  { %1776 = vmatpush1.bf16.msra.mxu0 %v5328_v62 }
  0xbd   :  { %1777 = vmatprep.subr.bf16.mxu0 %v5333_v63  ;;  %4897 = vmatmul.mubr.bf16.gmra.mrb[52].mxu1 %v5773_v0 }
  0xbe   :  { %4900 = vmatprep.mubr.msk.bf16.mxu1 %vm5554_vm0, %v5553_v32 }
  0xc0   :  { %1778 = vmatpush1.bf16.msra.mxu0 %v5331_v1 }
  0xc1   :  { %1779 = vmatprep.subr.bf16.mxu0 %v5337_v2 }
  0xc4   :  { %1780 = vmatpush1.bf16.msra.mxu0 %v5335_v3  ;;  %v5402_v3 = vld [vmem:[#allocation2 + $0x630] ss:$12 sps:$4 sm:$0xff]  }
  0xc5   :  { %1781 = vmatprep.subr.bf16.mxu0 %v5340_v4  ;;  %4901 = vmatmul.mubr.bf16.gmra.mrb[56].mxu1 %v5781_v5 }
  0xc8   :  { %1782 = vmatpush1.bf16.msra.mxu0 %v5338_v6  ;;  %v5407_v6 = vld [vmem:[#allocation2 + $0x64c] ss:$12 sps:$4 sm:$0xff]  }
  0xc9   :  { %1783 = vmatprep.subr.bf16.mxu0 %v5344_v9 }
  0xcc   :  { %1784 = vmatpush1.bf16.msra.mxu0 %v5342_v10 }
  0xcd   :  { %1785 = vmatprep.subr.bf16.mxu0 %v5347_v11 }
  0xd0   :  { %1786 = vmatpush1.bf16.msra.mxu0 %v5345_v13 }
  0xd1   :  { %1816 = vmatprep.subr.bf16.mxu0 %v5350_v14  ;;  %v5408_v14 = vld [vmem:[#allocation2 + $0x660] ss:$12 sps:$4 sm:$0xff]  }
  0xd3   :  { %1788 = vmatmul.mubr.bf16.vlgmr.msra.gmra.mrb[0].mxu0 %v5689_v51  ;;  %v5363_v51 = vld [vmem:[#allocation2 + $0x4f8] ss:$12 sps:$4 sm:$0xff]  }
  0xd4   :  { %1817 = vmatpush1.bf16.msra.mxu0 %v5348_v15  ;;  %1797 = vmatprep.mubr.bf16.mxu0 %v5695_v60  ;;  %v5366_v60 = vld [vmem:[#allocation2 + $0x510] ss:$12 sps:$4 sm:$0xff]  }
  0xd5   :  { %1818 = vmatprep.subr.bf16.mxu0 %v5353_v16  ;;  %v5413_v16 = vld [vmem:[#allocation2 + $0x67c] ss:$12 sps:$4 sm:$0xff]  }
  0xd8   :  { %1819 = vmatpush1.bf16.msra.mxu0 %v5351_v18  ;;  %v5411_v18 = vld [vmem:[#allocation2 + $0x678] ss:$12 sps:$4 sm:$0xff]  }
  0xd9   :  { %1820 = vmatprep.subr.bf16.mxu0 %v5356_v19  ;;  %v5416_v19 = vld [vmem:[#allocation2 + $0x694] ss:$12 sps:$4 sm:$0xff]  }
  0xdb   :  { %1798 = vmatmul.mubr.bf16.gmra.mrb[4].mxu0 %v5700_v61  ;;  %v5369_v61 = vld [vmem:[#allocation2 + $0x528] ss:$12 sps:$4 sm:$0xff]  }
  0xdc   :  { %1821 = vmatpush1.bf16.msra.mxu0 %v5354_v20  ;;  %1807 = vmatprep.mubr.bf16.mxu0 %v5707_v7  ;;  %v5372_v7 = vld [vmem:[#allocation2 + $0x540] ss:$12 sps:$4 sm:$0xff]  }
  0xdd   :  { %1822 = vmatprep.subr.bf16.mxu0 %v5359_v21  ;;  %v5419_v20 = vld [vmem:[#allocation2 + $0x6ac] ss:$12 sps:$4 sm:$0xff]  }
  0xe0   :  { %1823 = vmatpush1.bf16.msra.mxu0 %v5357_v22 }
  0xe1   :  { %1824 = vmatprep.subr.bf16.mxu0 %v5362_v24 }
  0xe3   :  { %1808 = vmatmul.mubr.bf16.gmra.mrb[8].mxu0 %v5709_v8  ;;  %v5378_v8 = vld [vmem:[#allocation2 + $0x570] ss:$12 sps:$4 sm:$0xff]  }
  0xe4   :  { %1825 = vmatpush1.bf16.msra.mxu0 %v5360_v26  ;;  %1848 = vmatprep.mubr.bf16.mxu0 %v5716_v17  ;;  %v5381_v17 = vld [vmem:[#allocation2 + $0x588] ss:$12 sps:$4 sm:$0xff]  }
  0xe5   :  { %1826 = vmatprep.subr.bf16.mxu0 %v5365_v27  ;;  %v5417_v27 = vld [vmem:[#allocation2 + $0x6a8] ss:$12 sps:$4 sm:$0xff]  }
  0xe8   :  { %1827 = vmatpush1.bf16.msra.mxu0 %v5363_v51 }
  0xe9   :  { %1828 = vmatprep.subr.bf16.mxu0 %v5368_v29 }
  0xec   :  { %1829 = vmatpush1.bf16.msra.mxu0 %v5366_v60 }
  0xed   :  { %1830 = vmatprep.subr.bf16.mxu0 %v5371_v31 }
  0xf0   :  { %1831 = vmatpush1.bf16.msra.mxu0 %v5369_v61 }
  0xf1   :  { %1832 = vmatprep.subr.bf16.mxu0 %v5374_v33 }
  0xf4   :  { %1833 = vmatpush1.bf16.msra.mxu0 %v5372_v7 }
  0xf5   :  { %1834 = vmatprep.subr.bf16.mxu0 %v5377_v36 }
  0xf8   :  { %1835 = vmatpush1.bf16.msra.mxu0 %v5375_v12 }
  0xf9   :  { %1836 = vmatprep.subr.bf16.mxu0 %v5380_v37 }
  0xfc   :  { %1837 = vmatpush1.bf16.msra.mxu0 %v5378_v8 }
  0xfd   :  { %1838 = vmatprep.subr.bf16.mxu0 %v5383_v38 }
 0x100   :  { %1839 = vmatpush1.bf16.msra.mxu0 %v5381_v17 }
 0x101   :  { %1840 = vmatprep.subr.bf16.mxu0 %v5386_v39 }
 0x104   :  { %1841 = vmatpush1.bf16.msra.mxu0 %v5384_v41 }
 0x105   :  { %1842 = vmatprep.subr.bf16.mxu0 %v5389_v42 }
 0x108   :  { %1843 = vmatpush1.bf16.msra.mxu0 %v5387_v44  ;;  %v4563_v34 = vpop.f32.mrb[0].mxu1 }
 0x109   :  { %1844 = vmatprep.subr.bf16.mxu0 %v5392_v45  ;;  %v4564_v48 = vpop.f32.mrb[1].mxu1 }
 0x10a   :  { %v4565_v49 = vadd.f32 %v4564_v48, %v4563_v34  ;;  %v4566_v50 = vpop.f32.mrb[2].mxu1 }
 0x10b   :  { %v4567_v52 = vpop.f32.mrb[3].mxu1 }
 0x10c   :  { %1845 = vmatpush1.bf16.msra.mxu0 %v5390_v25  ;;  %v4568_v43 = vadd.f32 %v4567_v52, %v4566_v50 }
 0x10d   :  { %1846 = vmatprep.subr.bf16.mxu0 %v5395_v47 }
 0x110   :  { %1847 = vmatpush1.bf16.msra.mxu0 %v5393_v35  ;;  %v4569_v58 = vpop.f32.mrb[4].mxu1 }
 0x111   :  { %1877 = vmatprep.subr.bf16.mxu0 %v5398_v53  ;;  %v4570_v62 = vpop.f32.mrb[5].mxu1 }
 0x112   :  { %v4571_v63 = vadd.f32 %v4570_v62, %v4569_v58  ;;  %v4572_v1 = vpop.f32.mrb[6].mxu1 }
 0x113   :  { %1849 = vmatmul.mubr.bf16.vlgmr.msra.gmra.mrb[0].mxu0 %v5722_v28  ;;  %v4573_v2 = vpop.f32.mrb[7].mxu1  ;;  %v5405_v28 = vld [vmem:[#allocation2 + $0x648] ss:$12 sps:$4 sm:$0xff]  }
 0x114   :  { %1878 = vmatpush1.bf16.msra.mxu0 %v5396_v54  ;;  %1858 = vmatprep.mubr.bf16.mxu0 %v5728_v30  ;;  %v4574_v4 = vadd.f32 %v4573_v2, %v4572_v1  ;;  %v5410_v30 = vld [vmem:[#allocation2 + $0x664] ss:$12 sps:$4 sm:$0xff]  }
 0x115   :  { %1879 = vmatprep.subr.bf16.mxu0 %v5401_v55 }
 0x118   :  { %1880 = vmatpush1.bf16.msra.mxu0 %v5399_v56  ;;  %v4575_v9 = vpop.f32.mrb[8].mxu1 }
 0x119   :  { %1881 = vmatprep.subr.bf16.mxu0 %v5404_v59  ;;  %v4576_v10 = vpop.f32.mrb[9].mxu1 }
 0x11a   :  { %v4577_v11 = vadd.f32 %v4576_v10, %v4575_v9  ;;  %v4578_v13 = vpop.f32.mrb[10].mxu1 }
 0x11b   :  { %1859 = vmatmul.mubr.bf16.gmra.mrb[4].mxu0 %v5741_v23  ;;  %v4579_v15 = vpop.f32.mrb[11].mxu1  ;;  %v5555_v23 = vmov 0  }
 0x11c   :  { %1882 = vmatpush1.bf16.msra.mxu0 %v5402_v3  ;;  %1868 = vmatprep.mubr.bf16.mxu0 %v5743_v40  ;;  %v5414_v40 = vld [vmem:[#allocation2 + $0x690] ss:$12 sps:$4 sm:$0xff]  }
 0x11d   :  { %1883 = vmatprep.subr.bf16.mxu0 %v5407_v6 }
 0x120   :  { %1884 = vmatpush1.bf16.msra.mxu0 %v5405_v28 }
 0x121   :  { %1885 = vmatprep.subr.bf16.mxu0 %v5410_v30 }
 0x123   :  { %1869 = vmatmul.mubr.bf16.gmra.mrb[8].mxu0 %v5751_v46 }
 0x124   :  { %1886 = vmatpush1.bf16.msra.mxu0 %v5408_v14  ;;  %1909 = vmatprep.mubr.bf16.mxu0 %v5555_v23 }
 0x125   :  { %1887 = vmatprep.subr.bf16.mxu0 %v5413_v16 }
 0x128   :  { %1888 = vmatpush1.bf16.msra.mxu0 %v5411_v18  ;;  %v4597_v21 = vpop.f32.mrb[12].mxu1 }
 0x129   :  { %1889 = vmatprep.subr.bf16.mxu0 %v5416_v19  ;;  %v4598_v22 = vpop.f32.mrb[13].mxu1 }
 0x12a   :  { %v4599_v24 = vadd.f32 %v4598_v22, %v4597_v21  ;;  %v4600_v26 = vpop.f32.mrb[14].mxu1 }
 0x12b   :  { %v4601_v51 = vpop.f32.mrb[15].mxu1 }
 0x12c   :  { %1890 = vmatpush1.bf16.msra.mxu0 %v5414_v40  ;;  %v2029_v29 = vadd.f32 %v4599_v24, %v4565_v49  ;;  %v4602_v46 = vadd.f32 %v4601_v51, %v4600_v26  ;;  %v2325_v51 = vld [vmem:[%s6485_s2 + $0x88] sm:$0xff] }
 0x12d   :  { %1891 = vmatprep.subr.bf16.mxu0 %v5419_v20 }
 0x12e   :  { %v2032_v60 = vadd.f32 %v4602_v46, %v4568_v43  ;;  %v2308_v46 = vld [vmem:[%s6485_s2] sm:$0xff] }
 0x130   :  { %1892 = vmatpush1.bf16.msra.mxu0 %v5417_v27  ;;  %v4603_v31 = vpop.f32.mrb[16].mxu1  ;;  %v2324_v27 = vld [vmem:[%s6485_s2 + $0x80] sm:$0xff] }
 0x131   :  { %4942 = vmatprep.subr.bf16.mxu0 %v5553_v32  ;;  %v4604_v61 = vpop.f32.mrb[17].mxu1 }
 0x132   :  { %v4605_v33 = vadd.f32 %v4604_v61, %v4603_v31  ;;  %v4606_v7 = vpop.f32.mrb[18].mxu1 }
 0x133   :  { %1910 = vmatmul.mubr.bf16.vlgmr.msra.gmra.mrb[0].mxu0 %v5765_v57  ;;  %v4607_v36 = vpop.f32.mrb[19].mxu1 }
 0x134   :  { %1919 = vmatprep.mubr.bf16.mxu0 %v5555_v23  ;;  %v2037_v12 = vadd.f32 %v4605_v33, %v4571_v63  ;;  %v4608_v37 = vadd.f32 %v4607_v36, %v4606_v7  ;;  %v2326_v36 = vld [vmem:[%s6485_s2 + $0x90] sm:$0xff] }
 0x136   :  { %v2040_v8 = vadd.f32 %v4608_v37, %v4574_v4 }
 0x138   :  { %v4609_v38 = vpop.f32.mrb[20].mxu1 }
 0x139   :  { %v4610_v17 = vpop.f32.mrb[21].mxu1 }
 0x13a   :  { %v4611_v39 = vadd.f32 %v4610_v17, %v4609_v38  ;;  %v4612_v41 = vpop.f32.mrb[22].mxu1  ;;  %v2310_v38 = vld [vmem:[%s6485_s2 + $0x10] sm:$0xff]  ;;  %v2311_v17 = vld [vmem:[%s6485_s2 + $0x18] sm:$0xff] }
 0x13b   :  { %1920 = vmatmul.mubr.bf16.gmra.mrb[4].mxu0 %v5773_v0  ;;  %v4613_v42 = vpop.f32.mrb[23].mxu1 }
 0x13c   :  { %1929 = vmatprep.mubr.bf16.mxu0 %v5555_v23  ;;  %v2045_v44 = vadd.f32 %v4611_v39, %v4577_v11  ;;  %v4996_v42 = vpack.c.bf16 %v2311_v17, %v2310_v38 }
 0x143   :  { %1930 = vmatmul.mubr.bf16.gmra.mrb[8].mxu0 %v5781_v5 }
 0x144   :  { %4950 = vmatprep.mubr.msk.bf16.mxu0 %vm5554_vm0, %v5553_v32 }
 0x148   :  { %v4631_v57 = vpop.f32.mrb[24].mxu1 }
 0x149   :  { %v4632_v45 = vpop.f32.mrb[25].mxu1 }
 0x14a   :  { %v4633_v25 = vadd.f32 %v4632_v45, %v4631_v57  ;;  %v4634_v47 = vpop.f32.mrb[26].mxu1  ;;  %v2329_v57 = vld [vmem:[%s6485_s2 + $0xa8] sm:$0xff] }
 0x14b   :  { %v4635_v34 = vpop.f32.mrb[27].mxu1 }
 0x14c   :  { %v2085_v48 = vadd.f32 %v4633_v25, %v2029_v29  ;;  %v4636_v49 = vadd.f32 %v4635_v34, %v4634_v47  ;;  %v4990_v29 = vpack.c.bf16 %v2325_v51, %v2324_v27  ;;  %v2312_v25 = vld [vmem:[%s6485_s2 + $0x20] sm:$0xff]  ;;  %v2313_v47 = vld [vmem:[%s6485_s2 + $0x28] sm:$0xff]  ;;  %v2323_v27 = vld [vmem:[%s6485_s2 + $0x78] sm:$0xff] }
 0x14d   :  { %v5000_v34 = vpack.c.bf16 %v2313_v47, %v2312_v25 }
 0x14e   :  { %v2088_v50 = vadd.f32 %v4636_v49, %v2032_v60  ;;  %v2309_v60 = vld [vmem:[%s6485_s2 + $0x8] sm:$0xff]  ;;  %4991 = vmatprep.subr.bf16.mxu1 %v4990_v29  ;;  %v5556_v29 = vmov 0.0|0.0  }
 0x14f   :  { %v4992_v31 = vpack.c.bf16 %v2309_v60, %v2308_v46 }
 0x150   :  { %v4637_v35 = vpop.f32.mrb[28].mxu1 }
 0x151   :  { %v4638_v0 = vpop.f32.mrb[29].mxu1  ;;  %4993 = vmatpush3.bf16.msra.mxu1 %v4992_v31 }
 0x152   :  { %v4639_v52 = vadd.f32 %v4638_v0, %v4637_v35  ;;  %v4640_v53 = vpop.f32.mrb[30].mxu1  ;;  %v2330_v35 = vld [vmem:[%s6485_s2 + $0xb0] sm:$0xff]  ;;  %v2331_v0 = vld [vmem:[%s6485_s2 + $0xb8] sm:$0xff] }
 0x153   :  { %v4641_v43 = vpop.f32.mrb[31].mxu1 }
 0x154   :  { %v2093_v54 = vadd.f32 %v4639_v52, %v2037_v12  ;;  %v4642_v55 = vadd.f32 %v4641_v43, %v4640_v53  ;;  %v2327_v12 = vld [vmem:[%s6485_s2 + $0x98] sm:$0xff]  ;;  %v5002_v53 = vpack.c.bf16 %v2331_v0, %v2330_v35  ;;  %v2314_v43 = vld [vmem:[%s6485_s2 + $0x30] sm:$0xff] }
 0x156   :  { %v2096_v56 = vadd.f32 %v4642_v55, %v2040_v8  ;;  %v4994_v8 = vpack.c.bf16 %v2327_v12, %v2326_v36 }
 0x158   :  { %v4643_v5 = vpop.f32.mrb[32].mxu1  ;;  %4995 = vmatprep.subr.bf16.mxu1 %v4994_v8 }
 0x159   :  { %v4644_v58 = vpop.f32.mrb[33].mxu1  ;;  %4997 = vmatpush3.bf16.msra.mxu1 %v4996_v42 }
 0x15a   :  { %v4645_v59 = vadd.f32 %v4644_v58, %v4643_v5  ;;  %v4646_v62 = vpop.f32.mrb[34].mxu1  ;;  %v2332_v58 = vld [vmem:[%s6485_s2 + $0xc0] sm:$0xff] }
 0x15b   :  { %v4647_v63 = vpop.f32.mrb[35].mxu1 }
 0x15c   :  { %v2101_v1 = vadd.f32 %v4645_v59, %v2045_v44  ;;  %v2328_v44 = vld [vmem:[%s6485_s2 + $0xa0] sm:$0xff]  ;;  %v2333_v59 = vld [vmem:[%s6485_s2 + $0xc8] sm:$0xff] }
 0x15d   :  { %v4998_v45 = vpack.c.bf16 %v2329_v57, %v2328_v44  ;;  %v5006_v62 = vpack.c.bf16 %v2333_v59, %v2332_v58  ;;  %v2316_v63 = vld [vmem:[%s6485_s2 + $0x40] sm:$0xff] }
 0x15f   :  { %4999 = vmatprep.subr.bf16.mxu1 %v4998_v45 }
 0x160   :  { %5001 = vmatpush3.bf16.msra.mxu1 %v5000_v34 }
 0x161   :  { %5003 = vmatprep.subr.bf16.mxu1 %v5002_v53 }
 0x168   :  { %v4665_v2 = vpop.f32.mrb[36].mxu1 }
 0x169   :  { %v4666_v3 = vpop.f32.mrb[37].mxu1 }
 0x16a   :  { %v4667_v4 = vadd.f32 %v4666_v3, %v4665_v2  ;;  %v4668_v6 = vpop.f32.mrb[38].mxu1 }
 0x16b   :  { %v4669_v28 = vpop.f32.mrb[39].mxu1 }
 0x16c   :  { %v4670_v30 = vadd.f32 %v4669_v28, %v4668_v6  ;;  %v2141_v9 = vadd.f32 %v4667_v4, %v2085_v48  ;;  %v2334_v6 = vld [vmem:[%s6485_s2 + $0xd0] sm:$0xff]  ;;  %v2335_v28 = vld [vmem:[%s6485_s2 + $0xd8] sm:$0xff] }
 0x16e   :  { %v2144_v10 = vadd.f32 %v4670_v30, %v2088_v50 }
 0x170   :  { %v4671_v11 = vpop.f32.mrb[40].mxu1 }
 0x171   :  { %v4672_v13 = vpop.f32.mrb[41].mxu1 }
 0x172   :  { %v4673_v14 = vadd.f32 %v4672_v13, %v4671_v11  ;;  %v4674_v15 = vpop.f32.mrb[42].mxu1  ;;  %v2319_v11 = vld [vmem:[%s6485_s2 + $0x58] sm:$0xff] }
 0x173   :  { %v4675_v16 = vpop.f32.mrb[43].mxu1 }
 0x174   :  { %v4676_v18 = vadd.f32 %v4675_v16, %v4674_v15  ;;  %v2149_v23 = vadd.f32 %v4673_v14, %v2093_v54  ;;  %v2315_v54 = vld [vmem:[%s6485_s2 + $0x38] sm:$0xff]  ;;  %v2336_v16 = vld [vmem:[%s6485_s2 + $0xe0] sm:$0xff] }
 0x175   :  { %v5004_v5 = vpack.c.bf16 %v2315_v54, %v2314_v43 }
 0x176   :  { %v2152_v19 = vadd.f32 %v4676_v18, %v2096_v56  ;;  %v2337_v18 = vld [vmem:[%s6485_s2 + $0xe8] sm:$0xff] }
 0x177   :  { %5005 = vmatpush3.bf16.msra.mxu1 %v5004_v5 }
 0x178   :  { %v4677_v40 = vpop.f32.mrb[44].mxu1  ;;  %5007 = vmatprep.subr.bf16.mxu1 %v5006_v62 }
 0x179   :  { %v4678_v20 = vpop.f32.mrb[45].mxu1 }
 0x17a   :  { %v4679_v21 = vadd.f32 %v4678_v20, %v4677_v40  ;;  %v4680_v22 = vpop.f32.mrb[46].mxu1  ;;  %v2321_v40 = vld [vmem:[%s6485_s2 + $0x68] sm:$0xff] }
 0x17b   :  { %v4681_v24 = vpop.f32.mrb[47].mxu1  ;;  %v2339_v22 = vld [vmem:[%s6485_s2 + $0xf8] sm:$0xff] }
 0x17c   :  { %v2157_v26 = vadd.f32 %v4679_v21, %v2101_v1  ;;  %v2317_v1 = vld [vmem:[%s6485_s2 + $0x48] sm:$0xff]  ;;  %v2338_v21 = vld [vmem:[%s6485_s2 + $0xf0] sm:$0xff] }
 0x17d   :  { %v5008_v2 = vpack.c.bf16 %v2317_v1, %v2316_v63  ;;  %v5018_v24 = vpack.c.bf16 %v2339_v22, %v2338_v21 }
 0x17f   :  { %5009 = vmatpush3.bf16.msra.mxu1 %v5008_v2 }
 0x188   :  { %v2196_v61 = vpop.f32.mrb[48].mxu1 }
 0x189   :  { %v5813_v33 = vadd.f32 %v2196_v61, %v2141_v9  ;;  %v4894_v7 = vpop.f32.mrb[49].mxu1  ;;  %v5010_v9 = vpack.c.bf16 %v2335_v28, %v2334_v6 }
 0x18a   :  { %v2199_v37 = vpop.f32.mrb[50].mxu1 }
 0x18b   :  { %v5827_v39 = vadd.f32 %v2199_v37, %v2144_v10  ;;  %v4895_v41 = vpop.f32.mrb[51].mxu1  ;;  %v2318_v10 = vld [vmem:[%s6485_s2 + $0x50] sm:$0xff]  ;;  %5011 = vmatprep.subr.bf16.mxu1 %v5010_v9  ;;  %v2256_v31 = vmul.f32 %v5813_v33, %v5813_v33  ;;  %v2239_v44 = vsel %vm2238_vm1, %v5813_v33, 0.0 }
 0x18c   :  { %v5012_v14 = vpack.c.bf16 %v2319_v11, %v2318_v10 }
 0x18d   :  { %v2259_v7 = vmul.f32 %v5827_v39, %v5827_v39  ;;  %v2240_v57 = vsel %vm2238_vm1, %v5827_v39, 0.0  ;;  %v2289_v25 = vsel %vm2238_vm1, %v2256_v31, 0.0 }
 0x18e   :  { %5013 = vmatpush3.bf16.msra.mxu1 %v5012_v14 }
 0x18f   :  { %v2290_v47 = vsel %vm2238_vm1, %v2259_v7, 0.0 }
 0x190   :  { %v2204_v48 = vpop.f32.mrb[52].mxu1  ;;  %v2291_v53 = vadd.f32 %v2290_v47, %v2289_v25 }
 0x191   :  { %v5841_v49 = vadd.f32 %v2204_v48, %v2149_v23  ;;  %v4898_v50 = vpop.f32.mrb[53].mxu1  ;;  %v5014_v23 = vpack.c.bf16 %v2337_v18, %v2336_v16 }
 0x192   :  { %v2207_v52 = vpop.f32.mrb[54].mxu1  ;;  %v2241_v50 = vadd.f32 %v2240_v57, %v2239_v44 }
 0x193   :  { %v5855_v55 = vadd.f32 %v2207_v52, %v2152_v19  ;;  %v4899_v56 = vpop.f32.mrb[55].mxu1  ;;  %v2320_v19 = vld [vmem:[%s6485_s2 + $0x60] sm:$0xff]  ;;  %5015 = vmatprep.subr.bf16.mxu1 %v5014_v23  ;;  %v2262_v34 = vmul.f32 %v5841_v49, %v5841_v49  ;;  %v2242_v43 = vsel %vm2238_vm1, %v5841_v49, 0.0 }
 0x194   :  { %v5016_v20 = vpack.c.bf16 %v2321_v40, %v2320_v19  ;;  %v2243_v10 = vadd.f32 %v2242_v43, %v2241_v50 }
 0x195   :  { %v2292_v58 = vsel %vm2238_vm1, %v2262_v34, 0.0  ;;  %v2265_v2 = vmul.f32 %v5855_v55, %v5855_v55 }
 0x196   :  { %5017 = vmatpush3.bf16.msra.mxu1 %v5016_v20  ;;  %v2293_v11 = vadd.f32 %v2292_v58, %v2291_v53 }
 0x197   :  { %5019 = vmatprep.subr.bf16.mxu1 %v5018_v24  ;;  %v2294_v14 = vsel %vm2238_vm1, %v2265_v2, 0.0  ;;  %v2340_v2 = vld [vmem:[%s6485_s2 + $0x100] sm:$0xff] }
 0x198   :  { %v2212_v3 = vpop.f32.mrb[56].mxu1  ;;  %v2295_v24 = vadd.f32 %v2294_v14, %v2293_v11 }
 0x199   :  { %v5869_v4 = vadd.f32 %v2212_v3, %v2157_v26  ;;  %v4902_v30 = vpop.f32.mrb[57].mxu1  ;;  %v2322_v26 = vld [vmem:[%s6485_s2 + $0x70] sm:$0xff] }
 0x19a   :  { %v2215_v13 = vpop.f32.mrb[58].mxu1  ;;  %v5020_v51 = vpack.c.bf16 %v2323_v27, %v2322_v26 }
 0x19b   :  { %v4903_v15 = vpop.f32.mrb[59].mxu1  ;;  %v2244_v13 = vsel %vm2238_vm1, %v5855_v55, 0.0  ;;  %v2246_v31 = vsel %vm2238_vm1, %v5869_v4, 0.0 }
 0x19c   :  { %5021 = vmatpush3.bf16.msra.mxu1 %v5020_v51  ;;  %v2268_v15 = vmul.f32 %v5869_v4, %v5869_v4  ;;  %v2245_v22 = vadd.f32 %v2244_v13, %v2243_v10 }
 0x19d   :  { %5022 = vmatprep.subr.bf16.mxu1 %v5556_v29 }
 0x19e   :  { %v2296_v7 = vsel %vm2238_vm1, %v2268_v15, 0.0 }
 0x19f   :  { %v2297_v44 = vadd.f32 %v2296_v7, %v2295_v24  ;;  %v2345_v24 = vld [vmem:[%s6485_s2 + $0x128] sm:$0xff]  ;;  %v2347_v7 = vld [vmem:[%s6485_s2 + $0x138] sm:$0xff] }
 0x1a1   :  { %v2298_v43 = vrot.slane %v2297_v44, 4 }
 0x206   :  { %v5908_v46 = vpop.f32.mrb[0].mxu0 }
 0x207   :  { %v5910_v60 = vpop.f32.mrb[1].mxu0  ;;  %v2254_v36 = vmul.f32 %v5908_v46, %v5908_v46 }
 0x208   :  { %v5914_v61 = vpop.f32.mrb[2].mxu0  ;;  %v2255_v38 = vmul.f32 %v5910_v60, %v5910_v60 }
 0x209   :  { %v2218_v12 = vadd.f32 %v5914_v61, %v5908_v46  ;;  %v2257_v37 = vmul.f32 %v5914_v61, %v5914_v61  ;;  %v5924_v8 = vpop.f32.mrb[3].mxu0 }
 0x20a   :  { %v2228_v17 = vadd.f32 %v5924_v8, %v5910_v60  ;;  %v2258_v41 = vmul.f32 %v5924_v8, %v5924_v8 }
 0x20b   :  { %v2269_v42 = vadd.f32 %v2257_v37, %v2254_v36 }
 0x20c   :  { %v2279_v45 = vadd.f32 %v2258_v41, %v2255_v38 }
 0x20e   :  { %v5940_v48 = vpop.f32.mrb[4].mxu0 }
 0x20f   :  { %v2219_v35 = vadd.f32 %v2218_v12, %v5940_v48  ;;  %v2260_v0 = vmul.f32 %v5940_v48, %v5940_v48  ;;  %v5945_v52 = vpop.f32.mrb[5].mxu0 }
 0x210   :  { %v2229_v54 = vadd.f32 %v2228_v17, %v5945_v52  ;;  %v2261_v56 = vmul.f32 %v5945_v52, %v5945_v52  ;;  %v5952_v5 = vpop.f32.mrb[6].mxu0 }
 0x211   :  { %v2270_v59 = vadd.f32 %v2269_v42, %v2260_v0  ;;  %v2220_v62 = vadd.f32 %v2219_v35, %v5952_v5  ;;  %v2263_v63 = vmul.f32 %v5952_v5, %v5952_v5  ;;  %v5958_v1 = vpop.f32.mrb[7].mxu0  ;;  %v2247_v42 = vadd.f32 %v2246_v31, %v2245_v22  ;;  %v2344_v22 = vld [vmem:[%s6485_s2 + $0x120] sm:$0xff]  ;;  %v2346_v31 = vld [vmem:[%s6485_s2 + $0x130] sm:$0xff] }
 0x212   :  { %v2280_v3 = vadd.f32 %v2279_v45, %v2261_v56  ;;  %v2230_v6 = vadd.f32 %v2229_v54, %v5958_v1  ;;  %v2264_v28 = vmul.f32 %v5958_v1, %v5958_v1 }
 0x213   :  { %v2271_v30 = vadd.f32 %v2270_v59, %v2263_v63  ;;  %v2248_v53 = vrot.slane %v2247_v42, 4 }
 0x214   :  { %v2281_v9 = vadd.f32 %v2280_v3, %v2264_v28  ;;  %v2341_v3 = vld [vmem:[%s6485_s2 + $0x108] sm:$0xff]  ;;  %v2299_v28 = vadd.f32 %v2298_v43, %v2297_v44  ;;  %v2532_v44 = vld [vmem:[%s6486_s3 + $0x20] sm:$0xff] }
 0x215   :  { %v5023_v14 = vpack.c.bf16 %v2341_v3, %v2340_v2  ;;  %v2504_v3 = vlaneseq }
 0x216   :  { %v5970_v16 = vpop.f32.mrb[8].mxu0 }
 0x217   :  { %v2221_v18 = vadd.f32 %v2220_v62, %v5970_v16  ;;  %v2266_v23 = vmul.f32 %v5970_v16, %v5970_v16  ;;  %v5975_v19 = vpop.f32.mrb[9].mxu0 }
 0x218   :  { %v2231_v40 = vadd.f32 %v2230_v6, %v5975_v19  ;;  %v2267_v20 = vmul.f32 %v5975_v19, %v5975_v19  ;;  %v1935_v21 = vpop.f32.mrb[10].mxu0  ;;  %v2249_v6 = vadd.f32 %v2248_v53, %v2247_v42  ;;  %v2529_v42 = vld [vmem:[%s6486_s3 + $0x8] sm:$0xff] }
 0x219   :  { %v2222_v26 = vrot.slane %v2221_v18, 4  ;;  %v2272_v27 = vadd.f32 %v2271_v30, %v2266_v23  ;;  %v1936_v51 = vpop.f32.mrb[11].mxu0  ;;  %v2343_v23 = vld [vmem:[%s6485_s2 + $0x118] sm:$0xff] }
 0x21a   :  { %v2232_v36 = vrot.slane %v2231_v40, 4  ;;  %v2282_v12 = vadd.f32 %v2281_v9, %v2267_v20  ;;  %v2300_v20 = vrot.slane %v2299_v28, 2  ;;  %v5029_v51 = vpack.c.bf16 %v2345_v24, %v2344_v22 }
 0x21b   :  { %v2223_v37 = vadd.f32 %v2222_v26, %v2221_v18  ;;  %v2273_v38 = vrot.slane %v2272_v27, 4  ;;  %v2342_v18 = vld [vmem:[%s6485_s2 + $0x110] sm:$0xff] }
 0x21c   :  { %v2233_v17 = vadd.f32 %v2232_v36, %v2231_v40  ;;  %v2283_v41 = vrot.slane %v2282_v12, 4  ;;  %v2250_v40 = vrot.slane %v2249_v6, 2  ;;  %v5026_v21 = vpack.c.bf16 %v2343_v23, %v2342_v18 }
 0x21d   :  { %v2224_v57 = vrot.slane %v2223_v37, 2  ;;  %v2274_v45 = vadd.f32 %v2273_v38, %v2272_v27  ;;  %v2301_v27 = vadd.f32 %v2300_v20, %v2299_v28  ;;  %v6030_v28 = vshrl.u32 %v2504_v3, 7  ;;  %v2533_v20 = vld [vmem:[%s6486_s3 + $0x28] sm:$0xff] }
 0x21e   :  { %v2234_v25 = vrot.slane %v2233_v17, 2  ;;  %v2284_v47 = vadd.f32 %v2283_v41, %v2282_v12  ;;  %v2251_v26 = vadd.f32 %v2250_v40, %v2249_v6  ;;  %v2530_v40 = vld [vmem:[%s6486_s3 + $0x10] sm:$0xff] }
 0x21f   :  { %v2225_v34 = vadd.f32 %v2224_v57, %v2223_v37  ;;  %v2275_v50 = vrot.slane %v2274_v45, 2  ;;  %v2302_v12 = vrot.slane %v2301_v27, 1  ;;  %v5032_v37 = vpack.c.bf16 %v2347_v7, %v2346_v31  ;;  %v5422_v31 = vld [vmem:[%s6489_s6 + $0xe8] sm:$0xff]  }
 0x220   :  { %v2235_v35 = vadd.f32 %v2234_v25, %v2233_v17  ;;  %v2285_v0 = vrot.slane %v2284_v47, 2  ;;  %v2252_v36 = vrot.slane %v2251_v26, 1  ;;  %v5034_v57 = vpack.c.bf16 %v2532_v44, %v2529_v42  ;;  %v2531_v25 = vld [vmem:[%s6486_s3 + $0x18] sm:$0xff]  ;;  %v5423_v7 = vld [vmem:[%s6489_s6 + $0xa8] sm:$0xff]   ;;  %v5430_v42 = vld [vmem:[%s6489_s6 + $0x260] sm:$0xff]  }
 0x221   :  { %v2226_v54 = vrot.slane %v2225_v34, 1  ;;  %v2276_v56 = vadd.f32 %v2275_v50, %v2274_v45  ;;  %v2303_v17 = vadd.f32 %v2302_v12, %v2301_v27  ;;  %v2528_v45 = vld [vmem:[%s6486_s3] sm:$0xff]  ;;  %v6040_v23 = vsub.s32 0, %v6030_v28  ;;  %v5425_v12 = vld [vmem:[%s6489_s6 + $0xb0] sm:$0xff]   ;;  %v5431_v44 = vld [vmem:[%s6489_s6 + $0x108] sm:$0xff]   ;;  %4943 = vmatpush3.bf16.msra.mxu0 %v5430_v42 }
 0x222   :  { %v2236_v58 = vrot.slane %v2235_v35, 1  ;;  %v2286_v59 = vadd.f32 %v2285_v0, %v2284_v47  ;;  %v2253_v38 = vadd.f32 %v2252_v36, %v2251_v26  ;;  %v5036_v47 = vpack.c.bf16 %v2531_v25, %v2528_v45  ;;  %v5420_v26 = vld [vmem:[%s6489_s6 + $0xe0] sm:$0xff]   ;;  %v5424_v36 = vld [vmem:[%s6489_s6 + $0xf0] sm:$0xff]   ;;  %4944 = vmatprep.subr.bf16.mxu0 %v5553_v32  ;;  %v5433_v45 = vld [vmem:[%s6489_s6 + $0x268] sm:$0xff]  }
 0x223   :  { %v2277_v62 = vrot.slane %v2276_v56, 1  ;;  %v2227_v30 = vadd.f32 %v2226_v54, %v2225_v34  ;;  %v5039_v24 = vpack.c.bf16 %v2533_v20, %v2530_v40  ;;  %v5434_v25 = vld [vmem:[%s6489_s6 + $0x110] sm:$0xff]  }
 0x224   :  { %v2287_v63 = vrot.slane %v2286_v59, 1  ;;  %v2237_v10 = vadd.f32 %v2236_v58, %v2235_v35  ;;  %v2307_v41 = vsel %vm2304_vm2, %v2253_v38, %v2303_v17  ;;  %v5427_v38 = vld [vmem:[%s6489_s6 + $0xb8] sm:$0xff]   ;;  %v5428_v17 = vld [vmem:[%s6489_s6 + $0x100] sm:$0xff]   ;;  %v5445_v42 = vld [vmem:[%s6489_s6 + $0x310] sm:$0xff]  }
 0x225   :  { %v2278_v9 = vadd.f32 %v2277_v62, %v2276_v56  ;;  %4945 = vmatpush3.bf16.msra.mxu0 %v5433_v45 }
 0x226   :  { %v2288_v11 = vadd.f32 %v2287_v63, %v2286_v59  ;;  %v5557_v63 = vmov 1966171168   ;;  %4946 = vmatprep.subr.bf16.mxu0 %v5553_v32 }
 0x227   :  { %v2305_v13 = vsel %vm2304_vm2, %v2227_v30, %v2278_v9  ;;  %v2502_v2 = vunpack.c.l.s4 %v5557_v63 }
 0x228   :  { %v2306_v15 = vsel %vm2304_vm2, %v2237_v10, %v2288_v11  ;;  %v2497_v11 = vld [vmem:[%s6487_s4] sm:$0x1] }
 0x229   :  { %2415 = vmatprep.mubr.f32.mxu1 %v2306_v15  ;;  %v2503_v6 = vunpack.c.0.s8 %v2502_v2  ;;  %v2518_v15 = vld [vmem:[%s6488_s5] sm:$0x1] }
 0x22a   :  { %2416 = vmatmul.mubr.f32.vlgmr.msra.gmra.mrb[60].mxu1 %v2305_v13 }
 0x22b   :  { %5024 = vmatpush3.bf16.msra.mxu1 %v5023_v14  ;;  %4920 = vmatprep.mubr.msk.f32.mxu1 %vm5554_vm0, %v5553_v32 }
 0x22c   :  { %5025 = vmatprep.subr.bf16.mxu1 %v5556_v29 }
 0x22f   :  { %5027 = vmatpush3.bf16.msra.mxu1 %v5026_v21 }
 0x230   :  { %5028 = vmatprep.subr.bf16.mxu1 %v5556_v29 }
 0x233   :  { %5030 = vmatpush3.bf16.msra.mxu1 %v5029_v51  ;;  %v5421_v51 = vld [vmem:[%s6489_s6 + $0xa0] sm:$0xff]  }
 0x234   :  { %5031 = vmatprep.subr.bf16.mxu1 %v5556_v29 }
 0x237   :  { %5033 = vmatpush3.bf16.msra.mxu1 %v5032_v37  ;;  %v5426_v37 = vld [vmem:[%s6489_s6 + $0xf8] sm:$0xff]  }
 0x238   :  { %5035 = vmatprep.subr.bf16.mxu1 %v5034_v57  ;;  %v5432_v57 = vld [vmem:[%s6489_s6 + $0xc8] sm:$0xff]  }
 0x23a   :  { %4921 = vmatmul.mubr.msk.f32.vlgmr.msra.gmra.mrb[62].mxu1 %vm2238_vm1, %v2307_v41  ;;  %v5429_v41 = vld [vmem:[%s6489_s6 + $0xc0] sm:$0xff]  }
 0x23b   :  { %2602 = vmatprep.mubr.f32.mxu1 %v5553_v32  ;;  %5037 = vmatpush1.bf16.msra.mxu1 %v5036_v47  ;;  %v5435_v47 = vld [vmem:[%s6489_s6 + $0xd0] sm:$0xff]  }
 0x23c   :  { %5038 = vmatprep.subr.bf16.mxu1 %v5556_v29  ;;  %v2506_v29 = vsub.s32 %v2503_v6, %v6030_v28 }
 0x2fd   :  { %v4726_v34 = vpop.f32.mrb[60].mxu1 }
 0x2fe   :  { %v4727_v50 = vpop.f32.mrb[61].mxu1 }
 0x2ff   :  { %v4728_v35 = vadd.f32 %v4727_v50, %v4726_v34  ;;  %v5436_v34 = vld [vmem:[%s6489_s6 + $0x270] sm:$0xff]   ;;  %v5437_v50 = vld [vmem:[%s6489_s6 + $0x118] sm:$0xff]  }
 0x300   :  { %4947 = vmatpush3.bf16.msra.mxu0 %v5436_v34  ;;  %v5446_v34 = vld [vmem:[%s6489_s6 + $0x138] sm:$0xff]  }
 0x301   :  { %4948 = vmatprep.subr.bf16.mxu0 %v5553_v32 }
 0x30d   :  { %v2487_v0 = vpop.f32.mrb[62].mxu1 }
 0x30e   :  { %v2488_v53 = vadd.f32 %v4728_v35, %v2487_v0  ;;  %v4922_v43 = vpop.f32.mrb[63].mxu1  ;;  %v5438_v35 = vld [vmem:[%s6489_s6 + $0xd8] sm:$0xff]  }
 0x30f   :  { %v5439_v0 = vld [vmem:[%s6489_s6 + $0x278] sm:$0xff]  }
 0x310   :  { %v2491_v54 = vmul.f32 0.00125, %v2488_v53  ;;  %4949 = vmatpush3.bf16.msra.mxu0 %v5439_v0  ;;  %v2708_v53 = vsub.s32 1, %v6030_v28 }
 0x311   :  { %4954 = vmatprep.subr.bf16.mxu0 %v5553_v32 }
 0x312   :  { %v2492_v56 = vmul.f32 %v2491_v54, %v2491_v54 }
 0x314   :  { %v2494_v58 = vrot.slane %v2492_v56, 7 }
 0x316   :  { %v2496_v59 = vsub.f32 %v2491_v54, %v2494_v58 }
 0x318   :  { %v2498_v62 = vadd.f32 1e-05, %v2496_v59 }
 0x31a   :  { %5520 = vrsqrt.f32 %v2498_v62 }
 0x324   :  { %v5521_v30 = vpop.eup %5520 }
 0x325   :  { %v2507_v9 = vrot.slane %v5521_v30, %v2506_v29 }
 0x327   :  { %v2508_v10 = vcombine.high %v2507_v9, %v2507_v9 }
 0x329   :  { %v2515_v13 = vrot.slane %v2508_v10, %v2506_v29 }
 0x32b   :  { %v2517_v14 = vmul.f32 %v2515_v13, %v2497_v11 }
 0x32d   :  { %v2519_v18 = vmul.f32 %v2517_v14, %v2491_v54 }
 0x32f   :  { %v2520_v21 = vsub.f32 %v2518_v15, %v2519_v18 }
 0x331   :  { %v2525_v22 = vrot.slane %v2520_v21, %v6040_v23 }
 0x333   :  { %v2527_v27 = vsel %vm2304_vm2, %v2517_v14, %v2525_v22 }
 0x334   :  { %4278 = vmatmul.mubr.msk.f32.vlgmr.msra.gmra.mrb[64].mxu1 %vm2534_vm3, %v2527_v27 }
 0x335   :  { %5040 = vmatpush3.bf16.msra.mxu1 %v5039_v24  ;;  %4927 = vmatprep.mubr.msk.f32.mxu1 %vm5554_vm0, %v5553_v32 }
 0x336   :  { %4741 = vmatprep.subr.bf16.mxu1 %v5420_v26 }
 0x338   :  { %4928 = vmatmul.mubr.msk.f32.vlgmr.msra.gmra.mrb[66].mxu1 %vm2534_vm3, %v2527_v27 }
 0x339   :  { %4742 = vmatpush3.bf16.msra.mxu1 %v5421_v51  ;;  %v5441_v51 = vld [vmem:[%s6489_s6 + $0x300] sm:$0xff]  }
 0x33a   :  { %4743 = vmatprep.subr.bf16.mxu1 %v5422_v31 }
 0x33d   :  { %4744 = vmatpush3.bf16.msra.mxu1 %v5423_v7 }
 0x33e   :  { %4745 = vmatprep.subr.bf16.mxu1 %v5424_v36 }
 0x341   :  { %4746 = vmatpush3.bf16.msra.mxu1 %v5425_v12  ;;  %v5442_v12 = vld [vmem:[%s6489_s6 + $0x128] sm:$0xff]  }
 0x342   :  { %4747 = vmatprep.subr.bf16.mxu1 %v5426_v37  ;;  %v5443_v37 = vld [vmem:[%s6489_s6 + $0x308] sm:$0xff]  }
 0x345   :  { %4748 = vmatpush3.bf16.msra.mxu1 %v5427_v38 }
 0x346   :  { %4749 = vmatprep.subr.bf16.mxu1 %v5428_v17 }
 0x349   :  { %4750 = vmatpush3.bf16.msra.mxu1 %v5429_v41  ;;  %v5444_v41 = vld [vmem:[%s6489_s6 + $0x130] sm:$0xff]  }
 0x34a   :  { %4751 = vmatprep.subr.bf16.mxu1 %v5431_v44 }
 0x34d   :  { %4752 = vmatpush3.bf16.msra.mxu1 %v5432_v57 }
 0x34e   :  { %4753 = vmatprep.subr.bf16.mxu1 %v5434_v25 }
 0x351   :  { %4754 = vmatpush3.bf16.msra.mxu1 %v5435_v47 }
 0x352   :  { %4755 = vmatprep.subr.bf16.mxu1 %v5437_v50 }
 0x355   :  { %4756 = vmatpush3.bf16.msra.mxu1 %v5438_v35  ;;  %v5448_v35 = vld [vmem:[%s6489_s6 + $0x220] sm:$0xff]  }
 0x356   :  { %4930 = vmatprep.subr.bf16.mxu1 %v5553_v32 }
 0x407   :  { %v2604_v43 = vpop.f32.mrb[64].mxu1 }
 0x408   :  { %v6121_v54 = vrot.slane %v2604_v43, %v6040_v23  ;;  %v2606_v56 = vpop.f32.mrb[65].mxu1  ;;  %v6123_v58 = vrot.slane %v2604_v43, %v2708_v53  ;;  %v5450_v43 = vld [vmem:[%s6489_s6 + $0x40] sm:$0xff]  }
 0x409   :  { %v2686_v59 = vrot.slane %v2606_v56, %v6040_v23  ;;  %v6126_v62 = vrot.slane %v2606_v56, %v2708_v53  ;;  %v5449_v56 = vld [vmem:[%s6489_s6 + $0x1e0] sm:$0xff]  }
 0x40a   :  { %v2694_v63 = vmul.f32 %v6121_v54, %v5914_v61  ;;  %v2700_v2 = vmul.f32 %v6121_v54, %v5952_v5  ;;  %v2691_v3 = vmul.f32 %v6121_v54, %v5908_v46  ;;  %v2703_v6 = vmul.f32 %v6121_v54, %v5970_v16 }
 0x40b   :  { %v2675_v28 = vpop.f32.mrb[66].mxu1  ;;  %v2695_v29 = vmul.f32 %v2686_v59, %v5924_v8  ;;  %v2701_v30 = vmul.f32 %v2686_v59, %v5958_v1  ;;  %v2692_v9 = vmul.f32 %v2686_v59, %v5910_v60  ;;  %v2704_v10 = vmul.f32 %v2686_v59, %v5975_v19 }
 0x40c   :  { %v2690_v61 = vrot.slane %v2675_v28, %v6040_v23  ;;  %v4929_v11 = vpop.f32.mrb[67].mxu1  ;;  %v2721_v5 = vadd.f32 %v6123_v58, %v2694_v63  ;;  %v6143_v13 = vadd.f32 %v6123_v58, %v2700_v2  ;;  %v2717_v15 = vrot.slane %v2675_v28, %v2708_v53  ;;  %v5452_v63 = vld [vmem:[%s6489_s6 + $0x228] sm:$0xff]  }
 0x40d   :  { %v2722_v46 = vadd.f32 %v6126_v62, %v2695_v29  ;;  %v6147_v16 = vadd.f32 %v6126_v62, %v2701_v30  ;;  %v6150_v8 = vadd.f32 %v6126_v62, %v2692_v9  ;;  %v6153_v60 = vadd.f32 %v6126_v62, %v2704_v10  ;;  %v5454_v28 = vld [vmem:[%s6489_s6 + $0x48] sm:$0xff]   ;;  %v5456_v9 = vld [vmem:[%s6489_s6 + $0x230] sm:$0xff]  }
 0x40e   :  { %v2693_v1 = vmul.f32 %v2690_v61, %v5813_v33  ;;  %v2699_v19 = vmul.f32 %v2690_v61, %v5841_v49  ;;  %v2702_v14 = vmul.f32 %v2690_v61, %v5855_v55  ;;  %vm2736_vm5 = vcmp.ge.f32.partialorder %v2721_v5, 0.0  ;;  %v5440_v33 = vld [vmem:[%s6489_s6 + $0x120] sm:$0xff]   ;;  %v5453_v30 = vld [vmem:[%s6489_s6 + $0x1e8] sm:$0xff]   ;;  %v5457_v11 = vld [vmem:[%s6489_s6 + $0x1f0] sm:$0xff]  }
 0x40f   :  { %vm2737_vm4 = vcmp.ge.f32.partialorder %v2722_v46, 0.0  ;;  %v2752_v18 = vmul.f32 0.01, %v2722_v46  ;;  %v2751_v22 = vmul.f32 0.01, %v2721_v5  ;;  %v2696_v31 = vmul.f32 %v2690_v61, %v5827_v39  ;;  %v5455_v10 = vld [vmem:[%s6489_s6 + $0x8] sm:$0xff]  }
 0x410   :  { %v6158_v23 = vadd.f32 %v2717_v15, %v2693_v1  ;;  %v6160_v40 = vadd.f32 %v2717_v15, %v2699_v19  ;;  %v2729_v20 = vadd.f32 %v2717_v15, %v2702_v14  ;;  %v2705_v36 = vmul.f32 %v2690_v61, %v5869_v4  ;;  %v5458_v61 = vld [vmem:[%s6489_s6 + $0x50] sm:$0xff]   ;;  %v5464_v1 = vld [vmem:[%s6489_s6 + $0x240] sm:$0xff]   ;;  %v5463_v19 = vld [vmem:[%s6489_s6 + $0x18] sm:$0xff]  }
 0x411   :  { %v2767_v21 = vsel %vm2737_vm4, %v2722_v46, %v2752_v18  ;;  %v2766_v27 = vsel %vm2736_vm5, %v2721_v5, %v2751_v22  ;;  %v6179_v39 = vadd.f32 %v6123_v58, %v2691_v3  ;;  %v2723_v38 = vadd.f32 %v2717_v15, %v2696_v31  ;;  %v5451_v3 = vld [vmem:[%s6489_s6] sm:$0xff]   ;;  %v5460_v5 = vld [vmem:[%s6489_s6 + $0x238] sm:$0xff]   ;;  %v5459_v46 = vld [vmem:[%s6489_s6 + $0x10] sm:$0xff]  }
 0x412   :  { %vm2744_vm6 = vcmp.ge.f32.partialorder %v2729_v20, 0.0  ;;  %v2759_v24 = vmul.f32 0.01, %v2729_v20  ;;  %v2822_v26 = vpack.c.bf16 %v2767_v21, %v2767_v21  ;;  %v2821_v49 = vpack.c.bf16 %v2766_v27, %v2766_v27  ;;  %v5466_v14 = vld [vmem:[%s6489_s6 + $0x60] sm:$0xff]   ;;  %v5468_v18 = vld [vmem:[%s6489_s6 + $0x248] sm:$0xff]   ;;  %v5474_v27 = vld [vmem:[%s6489_s6 + $0x70] sm:$0xff]  }
 0x413   :  { %v6185_v4 = vadd.f32 %v6123_v58, %v2703_v6  ;;  %v2732_v17 = vadd.f32 %v2717_v15, %v2705_v36  ;;  %v2698_v44 = vmul.f32 %v2686_v59, %v5945_v52  ;;  %v2753_v57 = vmul.f32 0.01, %v2723_v38  ;;  %v5465_v15 = vld [vmem:[%s6489_s6 + $0x200] sm:$0xff]   ;;  %v5470_v21 = vld [vmem:[%s6489_s6 + $0x68] sm:$0xff]   ;;  %v5478_v31 = vld [vmem:[%s6489_s6 + $0x78] sm:$0xff]  }
 0x414   :  { %3020 = vmatprep.mubr.bf16.mxu1 %v2822_v26  ;;  %v2774_v55 = vsel %vm2744_vm6, %v2729_v20, %v2759_v24  ;;  %v2697_v45 = vmul.f32 %v6121_v54, %v5940_v48  ;;  %vm2738_vm7 = vcmp.ge.f32.partialorder %v2723_v38, 0.0  ;;  %v2758_v25 = vmul.f32 0.01, %v6147_v16  ;;  %v5447_v48 = vld [vmem:[%s6489_s6 + $0x318] sm:$0xff]   ;;  %v5467_v20 = vld [vmem:[%s6489_s6 + $0x20] sm:$0xff]   ;;  %v5469_v22 = vld [vmem:[%s6489_s6 + $0x208] sm:$0xff]  }
 0x415   :  { %v3114_v7 = vpack.c.bf16 %v2774_v55, %v2774_v55  ;;  %3021 = vmatmul.mubr.bf16.vlgmr.msra.gmra.mrb[68].mxu1 %v2821_v49  ;;  %v6202_v47 = vadd.f32 %v6126_v62, %v2698_v44  ;;  %vm2743_vm8 = vcmp.ge.f32.partialorder %v6147_v16, 0.0  ;;  %v2762_v52 = vmul.f32 0.01, %v2732_v17  ;;  %v5472_v24 = vld [vmem:[%s6489_s6 + $0x250] sm:$0xff]   ;;  %v5471_v26 = vld [vmem:[%s6489_s6 + $0x28] sm:$0xff]   ;;  %v5476_v49 = vld [vmem:[%s6489_s6 + $0x258] sm:$0xff]  }
 0x416   :  { %4931 = vmatpush3.bf16.msra.mxu1 %v5440_v33  ;;  %4938 = vmatprep.mubr.msk.bf16.mxu1 %vm5554_vm0, %v5553_v32  ;;  %v6209_v50 = vadd.f32 %v6123_v58, %v2697_v45  ;;  %vm2747_vm9 = vcmp.ge.f32.partialorder %v2732_v17, 0.0  ;;  %v2749_v0 = vmul.f32 0.01, %v6150_v8  ;;  %v2768_v53 = vsel %vm2738_vm7, %v2723_v38, %v2753_v57  ;;  %v5473_v33 = vld [vmem:[%s6489_s6 + $0x210] sm:$0xff]   ;;  %v5477_v36 = vld [vmem:[%s6489_s6 + $0x218] sm:$0xff]   ;;  %v5483_v45 = vld [vmem:[%s6489_s6 + $0x2c8] sm:$0xff]  }
 0x417   :  { %4951 = vmatmul.mubr.msk.bf16.vlgmr.msra.gmra.mrb[12].mxu0 %vm2238_vm1, %v3114_v7  ;;  %4932 = vmatprep.subr.bf16.mxu1 %v5553_v32  ;;  %vm2734_vm10 = vcmp.ge.f32.partialorder %v6150_v8, 0.0  ;;  %v2773_v54 = vsel %vm2743_vm8, %v6147_v16, %v2758_v25  ;;  %v2777_v58 = vsel %vm2747_vm9, %v2732_v17, %v2762_v52  ;;  %v2823_v59 = vpack.c.bf16 %v2768_v53, %v2768_v53  ;;  %v5462_v16 = vld [vmem:[%s6489_s6 + $0x58] sm:$0xff]   ;;  %v5475_v55 = vld [vmem:[%s6489_s6 + $0x30] sm:$0xff]   ;;  %v5485_v52 = vld [vmem:[%s6489_s6 + $0x1c8] sm:$0xff]  }
 0x418   :  { %4955 = vmatpush3.bf16.msra.mxu0 %v5441_v51  ;;  %4962 = vmatprep.mubr.msk.bf16.mxu0 %vm5554_vm0, %v5553_v32  ;;  %v2764_v62 = vsel %vm2734_vm10, %v6150_v8, %v2749_v0  ;;  %v3113_v2 = vpack.c.bf16 %v2773_v54, %v2773_v54  ;;  %v3361_v6 = vpack.c.bf16 %v2777_v58, %v2777_v58  ;;  %v5461_v8 = vld [vmem:[%s6489_s6 + $0x1f8] sm:$0xff]   ;;  %v2757_v51 = vmul.f32 0.01, %v6143_v13  ;;  %v5488_v0 = vld [vmem:[%s6489_s6 + $0x1d0] sm:$0xff]   ;;  %v5492_v54 = vld [vmem:[%s6489_s6 + $0x2e0] sm:$0xff]  }
 0x419   :  { %4956 = vmatprep.subr.bf16.mxu0 %v5553_v32  ;;  %v2779_v29 = vpack.c.bf16 %v2764_v62, %v2764_v62  ;;  %vm2742_vm11 = vcmp.ge.f32.partialorder %v6143_v13, 0.0  ;;  %v2761_v7 = vmul.f32 0.01, %v6153_v60  ;;  %vm2746_vm12 = vcmp.ge.f32.partialorder %v6153_v60, 0.0  ;;  %v5479_v38 = vld [vmem:[%s6489_s6 + $0x38] sm:$0xff]   ;;  %v5493_v58 = vld [vmem:[%s6489_s6 + $0x2a0] sm:$0xff]  }
 0x41a   :  { %4933 = vmatpush3.bf16.msra.mxu1 %v5442_v12  ;;  %v2748_v12 = vmul.f32 0.01, %v6179_v39  ;;  %vm2733_vm13 = vcmp.ge.f32.partialorder %v6179_v39, 0.0  ;;  %v2772_v17 = vsel %vm2742_vm11, %v6143_v13, %v2757_v51  ;;  %v5482_v13 = vld [vmem:[%s6489_s6 + $0x1c0] sm:$0xff]   ;;  %v5490_v53 = vld [vmem:[%s6489_s6 + $0x298] sm:$0xff]   ;;  %vm2741_vm14 = vcmp.ge.f32.partialorder %v6160_v40, 0.0 }
 0x41b   :  { %4934 = vmatprep.subr.bf16.mxu1 %v5553_v32  ;;  %v3112_v57 = vpack.c.bf16 %v2772_v17, %v2772_v17  ;;  %v5494_v62 = vld [vmem:[%s6489_s6 + $0x2e8] sm:$0xff]   ;;  %vm2745_vm15 = vcmp.ge.f32.partialorder %v6185_v4, 0.0  ;;  %vm2735_vm2 = vcmp.ge.f32.partialorder %v6158_v23, 0.0  ;;  %v2754_v51 = vmul.f32 0.01, %v6209_v50 }
 0x41c   :  { %4957 = vmatpush3.bf16.msra.mxu0 %v5443_v37  ;;  %v5480_v37 = vld [vmem:[%s6489_s6 + $0x2c0] sm:$0xff]   ;;  %v2763_v44 = vsel %vm2733_vm13, %v6179_v39, %v2748_v12  ;;  %v5484_v39 = vld [vmem:[%s6489_s6 + $0x288] sm:$0xff]  }
 0x41d   :  { %4958 = vmatprep.subr.bf16.mxu0 %v5553_v32 }
 0x41e   :  { %4935 = vmatpush3.bf16.msra.mxu1 %v5444_v41  ;;  %v2776_v41 = vsel %vm2746_vm12, %v6153_v60, %v2761_v7  ;;  %v2778_v60 = vpack.c.bf16 %v2763_v44, %v2763_v44 }
 0x41f   :  { %4936 = vmatprep.subr.bf16.mxu1 %v5553_v32  ;;  %v3360_v25 = vpack.c.bf16 %v2776_v41, %v2776_v41 }
 0x420   :  { %4959 = vmatpush3.bf16.msra.mxu0 %v5445_v42  ;;  %v5481_v42 = vld [vmem:[%s6489_s6 + $0x280] sm:$0xff]  }
 0x421   :  { %4960 = vmatprep.subr.bf16.mxu0 %v5553_v32 }
 0x422   :  { %4937 = vmatpush3.bf16.msra.mxu1 %v5446_v34  ;;  %v5486_v34 = vld [vmem:[%s6489_s6 + $0x2d0] sm:$0xff]  }
 0x423   :  { %4768 = vmatprep.subr.bf16.mxu1 %v5448_v35  ;;  %v5489_v35 = vld [vmem:[%s6489_s6 + $0x2d8] sm:$0xff]  }
 0x424   :  { %4961 = vmatpush3.bf16.msra.mxu0 %v5447_v48  ;;  %v5487_v48 = vld [vmem:[%s6489_s6 + $0x290] sm:$0xff]  }
 0x425   :  { %4822 = vmatprep.subr.bf16.mxu0 %v5450_v43  ;;  %4939 = vmatmul.mubr.msk.bf16.vlgmr.msra.gmra.mrb[72].mxu1 %vm2238_vm1, %v2823_v59  ;;  %v2756_v43 = vmul.f32 0.01, %v6160_v40 }
 0x426   :  { %4769 = vmatpush3.bf16.msra.mxu1 %v5449_v56  ;;  %3311 = vmatprep.mubr.bf16.mxu1 %v3113_v2  ;;  %v5491_v56 = vld [vmem:[%s6489_s6 + $0x1d8] sm:$0xff]   ;;  %v5495_v2 = vld [vmem:[%s6489_s6 + $0x2a8] sm:$0xff]  }
 0x427   :  { %4963 = vmatmul.mubr.msk.bf16.vlgmr.msra.gmra.mrb[16].mxu0 %vm2238_vm1, %v3361_v6  ;;  %4770 = vmatprep.subr.bf16.mxu1 %v5452_v63  ;;  %v2771_v59 = vsel %vm2741_vm14, %v6160_v40, %v2756_v43  ;;  %v5497_v40 = vld [vmem:[%s6489_s6 + $0x2b0] sm:$0xff]   ;;  %v5498_v6 = vld [vmem:[%s6489_s6 + $0x2f8] sm:$0xff]  }
 0x428   :  { %4823 = vmatpush3.bf16.msra.mxu0 %v5451_v3  ;;  %3761 = vmatprep.mubr.bf16.mxu0 %v2779_v29  ;;  %v3070_v63 = vpack.c.bf16 %v2771_v59, %v2771_v59  ;;  %v5496_v3 = vld [vmem:[%s6489_s6 + $0x2f0] sm:$0xff]   ;;  %v5499_v29 = vld [vmem:[%s6489_s6 + $0x2b8] sm:$0xff]  }
 0x429   :  { %4824 = vmatprep.subr.bf16.mxu0 %v5454_v28  ;;  %v2760_v28 = vmul.f32 0.01, %v6185_v4 }
 0x42a   :  { %4771 = vmatpush3.bf16.msra.mxu1 %v5453_v30 }
 0x42b   :  { %4772 = vmatprep.subr.bf16.mxu1 %v5456_v9  ;;  %v2775_v30 = vsel %vm2745_vm15, %v6185_v4, %v2760_v28  ;;  %v5500_v9 = vld [vmem:[%s6489_s6 + $0x80] sm:$0xff]   ;;  %v5502_v4 = vld [vmem:[%s6489_s6 + $0x90] sm:$0xff]  }
 0x42c   :  { %4825 = vmatpush3.bf16.msra.mxu0 %v5455_v10  ;;  %v3359_v10 = vpack.c.bf16 %v2775_v30, %v2775_v30 }
 0x42d   :  { %4826 = vmatprep.subr.bf16.mxu0 %v5458_v61  ;;  %v5501_v61 = vld [vmem:[%s6489_s6 + $0x88] sm:$0xff]  }
 0x42e   :  { %4773 = vmatpush3.bf16.msra.mxu1 %v5457_v11  ;;  %v2750_v11 = vmul.f32 0.01, %v6158_v23 }
 0x42f   :  { %4774 = vmatprep.subr.bf16.mxu1 %v5460_v5  ;;  %v2755_v5 = vmul.f32 0.01, %v6202_v47 }
 0x430   :  { %4827 = vmatpush3.bf16.msra.mxu0 %v5459_v46  ;;  %v5503_v46 = vld [vmem:[%s6489_s6 + $0x98] sm:$0xff]  }
 0x431   :  { %4828 = vmatprep.subr.bf16.mxu0 %v5462_v16  ;;  %v5504_v16 = vld [vmem:[%s6489_s6 + $0x180] sm:$0xff]  }
 0x432   :  { %4775 = vmatpush3.bf16.msra.mxu1 %v5461_v8  ;;  %v2765_v8 = vsel %vm2735_vm2, %v6158_v23, %v2750_v11  ;;  %v5507_v23 = vld [vmem:[%s6489_s6 + $0x148] sm:$0xff]  }
 0x433   :  { %4776 = vmatprep.subr.bf16.mxu1 %v5464_v1 }
 0x434   :  { %4829 = vmatpush3.bf16.msra.mxu0 %v5463_v19  ;;  %v5505_v19 = vld [vmem:[%s6489_s6 + $0x140] sm:$0xff]  }
 0x435   :  { %4830 = vmatprep.subr.bf16.mxu0 %v5466_v14  ;;  %v2780_v14 = vpack.c.bf16 %v2765_v8, %v2765_v8 }
 0x436   :  { %4777 = vmatpush3.bf16.msra.mxu1 %v5465_v15  ;;  %v5506_v15 = vld [vmem:[%s6489_s6 + $0x188] sm:$0xff]  }
 0x437   :  { %4778 = vmatprep.subr.bf16.mxu1 %v5468_v18  ;;  %v5509_v18 = vld [vmem:[%s6489_s6 + $0x150] sm:$0xff]  }
 0x438   :  { %4831 = vmatpush3.bf16.msra.mxu0 %v5467_v20  ;;  %v5510_v20 = vld [vmem:[%s6489_s6 + $0x198] sm:$0xff]  }
 0x439   :  { %4832 = vmatprep.subr.bf16.mxu0 %v5470_v21  ;;  %v5511_v21 = vld [vmem:[%s6489_s6 + $0x158] sm:$0xff]  }
 0x43a   :  { %4779 = vmatpush3.bf16.msra.mxu1 %v5469_v22  ;;  %v5512_v22 = vld [vmem:[%s6489_s6 + $0x1a0] sm:$0xff]  }
 0x43b   :  { %4780 = vmatprep.subr.bf16.mxu1 %v5472_v24  ;;  %v5513_v24 = vld [vmem:[%s6489_s6 + $0x160] sm:$0xff]  }
 0x43c   :  { %4833 = vmatpush3.bf16.msra.mxu0 %v5471_v26  ;;  %v5514_v26 = vld [vmem:[%s6489_s6 + $0x1a8] sm:$0xff]  }
 0x43d   :  { %4834 = vmatprep.subr.bf16.mxu0 %v5474_v27  ;;  %v5515_v27 = vld [vmem:[%s6489_s6 + $0x168] sm:$0xff]  }
 0x43e   :  { %4781 = vmatpush3.bf16.msra.mxu1 %v5473_v33  ;;  %v5516_v33 = vld [vmem:[%s6489_s6 + $0x1b0] sm:$0xff]  }
 0x43f   :  { %4782 = vmatprep.subr.bf16.mxu1 %v5476_v49  ;;  %v5517_v49 = vld [vmem:[%s6489_s6 + $0x170] sm:$0xff]  }
 0x440   :  { %4835 = vmatpush3.bf16.msra.mxu0 %v5475_v55  ;;  %v5518_v55 = vld [vmem:[%s6489_s6 + $0x1b8] sm:$0xff]  }
 0x441   :  { %4836 = vmatprep.subr.bf16.mxu0 %v5478_v31  ;;  %v5519_v31 = vld [vmem:[%s6489_s6 + $0x178] sm:$0xff]  }
 0x442   :  { %4783 = vmatpush3.bf16.msra.mxu1 %v5477_v36 }
 0x443   :  { %4795 = vmatprep.subr.bf16.mxu1 %v5480_v37 }
 0x444   :  { %4837 = vmatpush3.bf16.msra.mxu0 %v5479_v38 }
 0x445   :  { %3312 = vmatmul.mubr.bf16.vlgmr.msra.gmra.mrb[76].mxu1 %v3112_v57  ;;  %4978 = vmatprep.subr.bf16.mxu0 %v5553_v32 }
 0x446   :  { %4796 = vmatpush3.bf16.msra.mxu1 %v5481_v42  ;;  %3558 = vmatprep.mubr.bf16.mxu1 %v3360_v25 }
 0x447   :  { %3762 = vmatmul.mubr.bf16.vlgmr.msra.gmra.mrb[20].mxu0 %v2778_v60  ;;  %4797 = vmatprep.subr.bf16.mxu1 %v5483_v45 }
 0x448   :  { %4979 = vmatpush3.bf16.msra.mxu0 %v5482_v13  ;;  %4986 = vmatprep.mubr.msk.bf16.mxu0 %vm5554_vm0, %v5553_v32 }
 0x449   :  { %4980 = vmatprep.subr.bf16.mxu0 %v5553_v32 }
 0x44a   :  { %4798 = vmatpush3.bf16.msra.mxu1 %v5484_v39 }
 0x44b   :  { %4799 = vmatprep.subr.bf16.mxu1 %v5486_v34 }
 0x44c   :  { %4981 = vmatpush3.bf16.msra.mxu0 %v5485_v52 }
 0x44d   :  { %4982 = vmatprep.subr.bf16.mxu0 %v5553_v32 }
 0x44e   :  { %4800 = vmatpush3.bf16.msra.mxu1 %v5487_v48 }
 0x44f   :  { %4801 = vmatprep.subr.bf16.mxu1 %v5489_v35 }
 0x450   :  { %4983 = vmatpush3.bf16.msra.mxu0 %v5488_v0 }
 0x451   :  { %4984 = vmatprep.subr.bf16.mxu0 %v5553_v32 }
 0x452   :  { %4802 = vmatpush3.bf16.msra.mxu1 %v5490_v53 }
 0x453   :  { %4803 = vmatprep.subr.bf16.mxu1 %v5492_v54 }
 0x454   :  { %4985 = vmatpush3.bf16.msra.mxu0 %v5491_v56 }
 0x456   :  { %4804 = vmatpush3.bf16.msra.mxu1 %v5493_v58 }
 0x457   :  { %4987 = vmatmul.mubr.msk.bf16.vlgmr.msra.gmra.mrb[24].mxu0 %vm2238_vm1, %v3070_v63  ;;  %4805 = vmatprep.subr.bf16.mxu1 %v5494_v62 }
 0x45a   :  { %4806 = vmatpush3.bf16.msra.mxu1 %v5495_v2 }
 0x45b   :  { %4807 = vmatprep.subr.bf16.mxu1 %v5496_v3 }
 0x45e   :  { %4808 = vmatpush3.bf16.msra.mxu1 %v5497_v40 }
 0x45f   :  { %4809 = vmatprep.subr.bf16.mxu1 %v5498_v6 }
 0x462   :  { %4810 = vmatpush3.bf16.msra.mxu1 %v5499_v29 }
 0x463   :  { %4966 = vmatprep.subr.bf16.mxu1 %v5553_v32 }
 0x465   :  { %3559 = vmatmul.mubr.bf16.vlgmr.msra.gmra.mrb[80].mxu1 %v3359_v10 }
 0x466   :  { %4967 = vmatpush3.bf16.msra.mxu1 %v5500_v9  ;;  %4974 = vmatprep.mubr.msk.bf16.mxu1 %vm5554_vm0, %v5553_v32  ;;  %vm2740_vm0 = vcmp.ge.f32.partialorder %v6202_v47, 0.0 }
 0x467   :  { %4968 = vmatprep.subr.bf16.mxu1 %v5553_v32  ;;  %v2770_v1 = vsel %vm2740_vm0, %v6202_v47, %v2755_v5  ;;  %v5508_v47 = vld [vmem:[%s6489_s6 + $0x190] sm:$0xff]  }
 0x46a   :  { %4969 = vmatpush3.bf16.msra.mxu1 %v5501_v61 }
 0x46b   :  { %4970 = vmatprep.subr.bf16.mxu1 %v5553_v32 }
 0x46e   :  { %4971 = vmatpush3.bf16.msra.mxu1 %v5502_v4 }
 0x46f   :  { %4972 = vmatprep.subr.bf16.mxu1 %v5553_v32  ;;  %v3069_v32 = vpack.c.bf16 %v2770_v1, %v2770_v1 }
 0x472   :  { %4973 = vmatpush3.bf16.msra.mxu1 %v5503_v46 }
 0x473   :  { %4849 = vmatprep.subr.bf16.mxu1 %v5504_v16 }
 0x475   :  { %4975 = vmatmul.mubr.msk.bf16.vlgmr.msra.gmra.mrb[84].mxu1 %vm2238_vm1, %v2780_v14  ;;  %vm2739_vm1 = vcmp.ge.f32.partialorder %v6209_v50, 0.0 }
 0x476   :  { %4850 = vmatpush3.bf16.msra.mxu1 %v5505_v19  ;;  %3964 = vmatprep.mubr.bf16.mxu1 %v3069_v32  ;;  %v2769_v7 = vsel %vm2739_vm1, %v6209_v50, %v2754_v51 }
 0x477   :  { %4851 = vmatprep.subr.bf16.mxu1 %v5506_v15  ;;  %v3068_v36 = vpack.c.bf16 %v2769_v7, %v2769_v7 }
 0x47a   :  { %4852 = vmatpush3.bf16.msra.mxu1 %v5507_v23 }
 0x47b   :  { %4853 = vmatprep.subr.bf16.mxu1 %v5508_v47 }
 0x47e   :  { %4854 = vmatpush3.bf16.msra.mxu1 %v5509_v18 }
 0x47f   :  { %4855 = vmatprep.subr.bf16.mxu1 %v5510_v20 }
 0x482   :  { %4856 = vmatpush3.bf16.msra.mxu1 %v5511_v21 }
 0x483   :  { %4857 = vmatprep.subr.bf16.mxu1 %v5512_v22  ;;  %v4545_v22 = vld [vmem:[%s6490_s7] ss:$0 sm:$0xff] }
 0x486   :  { %4858 = vmatpush3.bf16.msra.mxu1 %v5513_v24 }
 0x487   :  { %4859 = vmatprep.subr.bf16.mxu1 %v5514_v26 }
 0x48a   :  { %4860 = vmatpush3.bf16.msra.mxu1 %v5515_v27 }
 0x48b   :  { %4861 = vmatprep.subr.bf16.mxu1 %v5516_v33 }
 0x48e   :  { %4862 = vmatpush3.bf16.msra.mxu1 %v5517_v49 }
 0x48f   :  { %4863 = vmatprep.subr.bf16.mxu1 %v5518_v55 }
 0x492   :  { %4864 = vmatpush3.bf16.msra.mxu1 %v5519_v31 }
 0x495   :  { %3965 = vmatmul.mubr.bf16.vlgmr.msra.gmra.mrb[88].mxu1 %v3068_v36 }
 0x4e8   :  { %v4757_v12 = vpop.f32.mrb[68].mxu1 }
 0x4e9   :  { %v4758_v37 = vpop.f32.mrb[69].mxu1 }
 0x4ea   :  { %v3353_v38 = vpop.f32.mrb[12].mxu0  ;;  %v4759_v17 = vadd.f32 %v4758_v37, %v4757_v12  ;;  %v4760_v41 = vpop.f32.mrb[70].mxu1 }
 0x4eb   :  { %v4952_v42 = vpop.f32.mrb[13].mxu0  ;;  %v4761_v44 = vpop.f32.mrb[71].mxu1 }
 0x4ec   :  { %v3356_v57 = vpop.f32.mrb[14].mxu0 }
 0x4ed   :  { %v4953_v45 = vpop.f32.mrb[15].mxu0 }
 0x4f8   :  { %v3062_v25 = vpop.f32.mrb[72].mxu1 }
 0x4f9   :  { %v3063_v13 = vadd.f32 %v4759_v17, %v3062_v25  ;;  %v4940_v60 = vpop.f32.mrb[73].mxu1 }
 0x4fa   :  { %v3065_v39 = vpop.f32.mrb[74].mxu1  ;;  %v3600_v34 = vpop.f32.mrb[16].mxu0 }
 0x4fb   :  { %v4941_v52 = vpop.f32.mrb[75].mxu1  ;;  %v4964_v48 = vpop.f32.mrb[17].mxu0 }
 0x4fc   :  { %v3603_v50 = vpop.f32.mrb[18].mxu0 }
 0x4fd   :  { %v4965_v35 = vpop.f32.mrb[19].mxu0 }
 0x518   :  { %v4784_v0 = vpop.f32.mrb[76].mxu1 }
 0x519   :  { %v4785_v53 = vpop.f32.mrb[77].mxu1 }
 0x51a   :  { %v4786_v43 = vadd.f32 %v4785_v53, %v4784_v0  ;;  %v4787_v54 = vpop.f32.mrb[78].mxu1  ;;  %v4838_v56 = vpop.f32.mrb[20].mxu0 }
 0x51b   :  { %v4788_v58 = vpop.f32.mrb[79].mxu1  ;;  %v4839_v59 = vpop.f32.mrb[21].mxu0 }
 0x51c   :  { %v3354_v62 = vadd.f32 %v4786_v43, %v3353_v38  ;;  %v4840_v63 = vadd.f32 %v4839_v59, %v4838_v56  ;;  %v4841_v2 = vpop.f32.mrb[22].mxu0 }
 0x51d   :  { %v4842_v3 = vpop.f32.mrb[23].mxu0 }
 0x51e   :  { %v3764_v40 = vadd.f32 %v4840_v63, %v3063_v13 }
 0x52a   :  { %v4006_v6 = vpop.f32.mrb[24].mxu0 }
 0x52b   :  { %v4988_v28 = vpop.f32.mrb[25].mxu0 }
 0x52c   :  { %v4009_v29 = vpop.f32.mrb[26].mxu0 }
 0x52d   :  { %v4989_v30 = vpop.f32.mrb[27].mxu0 }
 0x538   :  { %v4811_v9 = vpop.f32.mrb[80].mxu1 }
 0x539   :  { %v4812_v10 = vpop.f32.mrb[81].mxu1 }
 0x53a   :  { %v4813_v61 = vadd.f32 %v4812_v10, %v4811_v9  ;;  %v4814_v4 = vpop.f32.mrb[82].mxu1 }
 0x53b   :  { %v4815_v11 = vpop.f32.mrb[83].mxu1 }
 0x53c   :  { %v3601_v5 = vadd.f32 %v4813_v61, %v3600_v34 }
 0x548   :  { %v3803_v46 = vpop.f32.mrb[84].mxu1 }
 0x549   :  { %v3804_v16 = vadd.f32 %v3803_v46, %v3764_v40  ;;  %v4976_v8 = vpop.f32.mrb[85].mxu1 }
 0x54a   :  { %v3806_v1 = vpop.f32.mrb[86].mxu1 }
 0x54b   :  { %v4977_v19 = vpop.f32.mrb[87].mxu1 }
 0x568   :  { %v4865_v14 = vpop.f32.mrb[88].mxu1 }
 0x569   :  { %v4866_v15 = vpop.f32.mrb[89].mxu1 }
 0x56a   :  { %v4867_v32 = vadd.f32 %v4866_v15, %v4865_v14  ;;  %v4868_v23 = vpop.f32.mrb[90].mxu1 }
 0x56b   :  { %v4869_v47 = vpop.f32.mrb[91].mxu1 }
 0x56c   :  { %v3967_v18 = vadd.f32 %v4867_v32, %v3354_v62 }
 0x56e   :  { %v4007_v20 = vadd.f32 %v4006_v6, %v3967_v18 }
 0x570   :  { %v4012_v21 = vadd.f32 %v4007_v20, %v3804_v16 }
 0x572   :  { %v4013_v24 = vadd.f32 %v4012_v21, %v3601_v5 }
 0x574   :  { %v4021_v26 = vadd.f32 %v4545_v22, %v4013_v24 }
 0x576   :  { %v4546_v27 = vmul.f32 -1.442695, %v4021_v26 }
 0x578   :  { %5522 = vpow2.f32 %v4546_v27 }
 0x582   :  { %v5523_v33 = vpop.eup %5522 }
 0x583   :  { %v4025_v49 = vadd.f32 1.0, %v5523_v33 }
 0x585   :  { %5524 = vrcp.f32 %v4025_v49 }
 0x58f   :  { %v5525_v55 = vpop.eup %5524 }
 0x590   :  { %4028 = vst.msk [vmem:[%s6491_s8] sm:$0xff] %vm2534_vm3, %v5525_v55 }
 0x591   :  { %4033 = vsyncpa [#allocation3], 1 }

</bundles_post_ra>
